<compile_context>
chip_gen: v7x
topology: tpu7x:2x2x1
jax: 0.10.0
libtpu: 0.0.40
codegen_flags: <defaults>
</compile_context>

<pallas_src>
import functools

import jax
import jax.numpy as jnp
from jax.experimental import pallas as pl
from jax.experimental.pallas import tpu as pltpu


_SQRT_2_OVER_PI = 0.7978845608028654  # sqrt(2/pi); matches torch gelu(approximate='tanh')
_MIB = 1024 * 1024


def _round_up(x, m):
    return (x + m - 1) // m * m


def _device_vmem_bytes(default=64 * _MIB):
    """Trace-time VMEM capacity query; conservative fallback (v7x size)."""
    try:
        info = pltpu.get_tpu_info()
        v = getattr(info, "vmem_capacity_bytes", None)
        if v:
            return int(v)
    except Exception:
        pass
    return default


def _siglip_mlp_kernel(x_ref, w1_ref, b1_ref, w2_ref, b2_ref, o_ref, *, i_chunk):
    """Fused fc1 + tanh-GELU + fc2 for one (tm, Hp) token tile.

    The intermediate dim Ip is walked in static chunks of <= i_chunk so the
    live h/g temporaries stay small; the full weights remain resident in VMEM.
    """
    x = x_ref[...]                       # (tm, Hp), compute dtype (bf16)
    tm, Hp = o_ref.shape
    Ip = w1_ref.shape[1]

    acc = jnp.zeros((tm, Hp), jnp.float32)
    start = 0
    while start < Ip:                    # static trip count, static slices
        ti = min(i_chunk, Ip - start)
        # fc1 chunk: (tm, Hp) @ (Hp, ti) on the MXU, f32 accumulation.
        h = jnp.dot(x, w1_ref[:, start:start + ti],
                    preferred_element_type=jnp.float32)
        h = h + b1_ref[:, start:start + ti]          # f32 bias, broadcast rows
        # tanh-approx GELU in f32 (EUP tanh; matches torch approximate='tanh').
        g = 0.5 * h * (1.0 + jnp.tanh(
            _SQRT_2_OVER_PI * (h + 0.044715 * h * h * h)))
        # fc2 chunk: (tm, ti) @ (ti, Hp); feed MXU in weight dtype, f32 accum.
        acc = acc + jnp.dot(g.astype(w2_ref.dtype),
                            w2_ref[start:start + ti, :],
                            preferred_element_type=jnp.float32)
        start += ti

    o_ref[...] = (acc + b2_ref[...]).astype(o_ref.dtype)


@functools.partial(
    jax.jit,
    static_argnames=("tm", "compute_dtype", "out_dtype", "weight_buffers",
                     "i_chunk_max"))
def siglip_mlp(x, w1, b1, w2, b2, *, tm=None, compute_dtype=jnp.bfloat16,
               out_dtype=None, weight_buffers=None, i_chunk_max=1024):
    """x: [B,S,H]; w1: [H,I]; b1: [I]; w2: [I,H]; b2: [H] -> [B,S,H]."""
    B, S, H = x.shape
    I = w1.shape[1]
    assert w1.shape == (H, I) and b1.shape == (I,)
    assert w2.shape == (I, H) and b2.shape == (H,)

    cd = jnp.dtype(compute_dtype)
    od = jnp.dtype(out_dtype) if out_dtype is not None else x.dtype

    vmem_cap = _device_vmem_bytes()

    # Single resident weight copy when the installed Pallas has pl.Buffered
    # (static capability check — no runtime device probe during tracing).
    if weight_buffers is None:
        weight_buffers = 1 if hasattr(pl, "Buffered") else 2
    single_buffered = (weight_buffers == 1) and hasattr(pl, "Buffered")

    # ---- lane-dense padding of feature dims --------------------------------
    Hp = _round_up(H, 128)   # lane-dense x / output / fc2 reduction
    Ip = _round_up(I, 256)   # lane-dense fc1 output, matches 256-wide MXU panels

    # ---- token tiling (pad ragged M; >=2 grid steps for v7x megacore) ------
    M = B * S
    row_align = 16 if cd.itemsize == 2 else 8
    if tm is None:
        tm = 512 if vmem_cap >= 100 * _MIB else 256   # per-generation default
    tm_eff = _round_up(min(int(tm), _round_up(M, row_align)), row_align)
    if M > row_align and _round_up(M, tm_eff) // tm_eff < 2:
        tm_eff = _round_up(pl.cdiv(M, 2), row_align)
    Mp = _round_up(M, tm_eff)
    grid_m = Mp // tm_eff

    i_chunk = min(Ip, int(i_chunk_max))

    # ---- operands (bf16 matmul inputs, f32 biases), zero-padded ------------
    x2d = x.reshape(M, H).astype(cd)
    if Mp != M or Hp != H:
        x2d = jnp.pad(x2d, ((0, Mp - M), (0, Hp - H)))
    w1c = w1.astype(cd)
    w2c = w2.astype(cd)
    if Hp != H or Ip != I:
        w1c = jnp.pad(w1c, ((0, Hp - H), (0, Ip - I)))
        w2c = jnp.pad(w2c, ((0, Ip - I), (0, Hp - H)))
    b1p = jnp.pad(b1.astype(jnp.float32), (0, Ip - I)).reshape(1, Ip)
    b2p = jnp.pad(b2.astype(jnp.float32), (0, Hp - H)).reshape(1, Hp)

    # ---- resident (grid-invariant) operand specs ----------------------------
    def resident(shape):
        if single_buffered:
            return pl.BlockSpec(shape, lambda i: (0, 0),
                                pipeline_mode=pl.Buffered(1))
        return pl.BlockSpec(shape, lambda i: (0, 0))

    # ---- VMEM budget, clamped to real device capacity -----------------------
    w_bufs = 1 if single_buffered else 2
    est_vmem = (
        w_bufs * 2 * Hp * Ip * cd.itemsize                 # fc1 + fc2 weights
        + w_bufs * (Ip + Hp) * 4                           # f32 biases
        + 2 * tm_eff * Hp * cd.itemsize                    # x tile (double buf)
        + 2 * tm_eff * Hp * od.itemsize                    # out tile (double buf)
        + tm_eff * Hp * 4                                  # f32 accumulator
        + tm_eff * i_chunk * (4 + 4 + cd.itemsize)         # h, g (f32) + g cast
    )
    vmem_limit = int(min(vmem_cap - 8 * _MIB,
                         max(32 * _MIB, est_vmem * 3 // 2)))

    cost = pl.CostEstimate(
        flops=4 * Mp * Hp * Ip,            # 2*M*H*I (fc1) + 2*M*I*H (fc2), padded
        transcendentals=Mp * Ip,           # tanh per fc1 activation
        bytes_accessed=(Mp * Hp * (cd.itemsize + od.itemsize)
                        + 2 * Hp * Ip * cd.itemsize
                        + (Ip + Hp) * 4),
    )

    kernel = functools.partial(_siglip_mlp_kernel, i_chunk=i_chunk)

    out2d = pl.pallas_call(
        kernel,
        out_shape=jax.ShapeDtypeStruct((Mp, Hp), od),
        grid_spec=pltpu.PrefetchScalarGridSpec(
            num_scalar_prefetch=0,
            grid=(grid_m,),
            in_specs=[
                pl.BlockSpec((tm_eff, Hp), lambda i: (i, 0)),  # x tile (pipelined)
                resident((Hp, Ip)),                            # w1 (resident)
                resident((1, Ip)),                             # b1
                resident((Ip, Hp)),                            # w2 (resident)
                resident((1, Hp)),                             # b2
            ],
            out_specs=pl.BlockSpec((tm_eff, Hp), lambda i: (i, 0)),
        ),
        compiler_params=pltpu.CompilerParams(
            dimension_semantics=("parallel",),   # megacore-shards the token axis
            vmem_limit_bytes=vmem_limit,
        ),
        cost_estimate=cost,
    )(x2d, w1c, b1p, w2c, b2p)

    return out2d[:M, :H].reshape(B, S, H)


def _reference(x, w1, b1, w2, b2):
    h = jnp.einsum("bsh,hi->bsi", x, w1) + b1
    g = 0.5 * h * (1.0 + jnp.tanh(_SQRT_2_OVER_PI * (h + 0.044715 * h ** 3)))
    return jnp.einsum("bsi,ih->bsh", g, w2) + b2


if __name__ == "__main__":
    # Small config: hidden_size=32, intermediate_size=128, batch=2, seq=100.
    # M=200 is deliberately NOT a multiple of the tile (exercises M padding),
    # H=32 / I=128 exercise the lane-dense feature padding (H->128, I->256),
    # and the >=2-grid-step rule exercises pipelining + megacore sharding.
    B, S, H, I = 2, 100, 32, 128

    key = jax.random.PRNGKey(0)
    kx, k1, k2, k3, k4 = jax.random.split(key, 5)

    x = jax.random.normal(kx, (B, S, H), dtype=jnp.float32)
    # Deterministic synthetic parameters (not a checkpoint load).
    w1 = jax.random.normal(k1, (H, I), dtype=jnp.float32) * (1.0 / H ** 0.5)
    b1 = jax.random.normal(k2, (I,), dtype=jnp.float32) * 0.01
    w2 = jax.random.normal(k3, (I, H), dtype=jnp.float32) * (1.0 / I ** 0.5)
    b2 = jax.random.normal(k4, (H,), dtype=jnp.float32) * 0.01

    try:
        out = siglip_mlp(x, w1, b1, w2, b2)
    except Exception:
        # Robust fallback if this Pallas build rejects pipeline_mode=Buffered(1).
        out = siglip_mlp(x, w1, b1, w2, b2, weight_buffers=2)
    jax.block_until_ready(out)
    assert out.shape == (B, S, H)

    # Tight check vs. a reference fed the same bf16-quantized operands
    # (isolates kernel correctness from the intentional bf16 cast).
    xq = x.astype(jnp.bfloat16).astype(jnp.float32)
    w1q = w1.astype(jnp.bfloat16).astype(jnp.float32)
    w2q = w2.astype(jnp.bfloat16).astype(jnp.float32)
    ref_q = _reference(xq, w1q, b1, w2q, b2)
    assert jnp.allclose(out, ref_q, atol=2e-2, rtol=2e-2), \
        float(jnp.max(jnp.abs(out - ref_q)))

    # Looser check vs. the full-f32 PyTorch-equivalent reference.
    ref = _reference(x, w1, b1, w2, b2)
    assert jnp.allclose(out, ref, atol=1e-1, rtol=1e-1), \
        float(jnp.max(jnp.abs(out - ref)))

    print("KERNEL_OK")
</pallas_src>

<mosaic_0001>
module attributes {stable_mosaic.version = 11 : i64} {
  func.func @_siglip_mlp_kernel(%arg0: i32, %arg1: memref<112x128xbf16, #tpu.memory_space<vmem>>, %arg2: memref<128x256xbf16, #tpu.memory_space<vmem>>, %arg3: memref<1x256xf32, #tpu.memory_space<vmem>>, %arg4: memref<256x128xbf16, #tpu.memory_space<vmem>>, %arg5: memref<1x128xf32, #tpu.memory_space<vmem>>, %arg6: memref<112x128xf32, #tpu.memory_space<vmem>>) attributes {dimension_semantics = [#tpu.dimension_semantics<parallel>], iteration_bounds = array<i64: 2>, scalar_prefetch = 0 : i64, scratch_operands = 0 : i64, tpu.core_type = #tpu.core_type<tc>, window_params = [{transform_indices = @transform_0, window_bounds = array<i64: 112, 128>}, {pipeline_mode = #tpu.pipeline_mode<synchronous>, transform_indices = @transform_1, window_bounds = array<i64: 128, 256>}, {pipeline_mode = #tpu.pipeline_mode<synchronous>, transform_indices = @transform_2, window_bounds = array<i64: 1, 256>}, {pipeline_mode = #tpu.pipeline_mode<synchronous>, transform_indices = @transform_3, window_bounds = array<i64: 256, 128>}, {pipeline_mode = #tpu.pipeline_mode<synchronous>, transform_indices = @transform_4, window_bounds = array<i64: 1, 128>}, {transform_indices = @transform_5, window_bounds = array<i64: 112, 128>}]} {
    %c0 = arith.constant 0 : index
    %c0_0 = arith.constant 0 : index
    %0 = vector.load %arg1[%c0, %c0_0] : memref<112x128xbf16, #tpu.memory_space<vmem>>, vector<112x128xbf16>
    %cst = arith.constant 0.000000e+00 : f32
    %1 = vector.broadcast %cst : f32 to vector<112x128xf32>
    %c0_1 = arith.constant 0 : index
    %c0_2 = arith.constant 0 : index
    %2 = vector.load %arg2[%c0_1, %c0_2] : memref<128x256xbf16, #tpu.memory_space<vmem>>, vector<128x256xbf16>
    %cst_3 = arith.constant dense<0.000000e+00> : vector<112x256xf32>
    %3 = tpu.matmul %0, %2, %cst_3 {dimension_numbers = #tpu.dot_dimension_numbers<[1], [0], [0], [1], [0, 0, 1, 1], [], []>} : vector<112x128xbf16>, vector<128x256xbf16>, vector<112x256xf32> -> vector<112x256xf32>
    %c0_4 = arith.constant 0 : index
    %c0_5 = arith.constant 0 : index
    %4 = vector.load %arg3[%c0_4, %c0_5] : memref<1x256xf32, #tpu.memory_space<vmem>>, vector<1x256xf32>
    %5 = vector.broadcast %4 : vector<1x256xf32> to vector<112x256xf32>
    %6 = arith.addf %3, %5 : vector<112x256xf32>
    %cst_6 = arith.constant 5.000000e-01 : f32
    %7 = vector.broadcast %cst_6 : f32 to vector<112x256xf32>
    %8 = arith.mulf %7, %6 : vector<112x256xf32>
    %cst_7 = arith.constant 4.471500e-02 : f32
    %9 = vector.broadcast %cst_7 : f32 to vector<112x256xf32>
    %10 = arith.mulf %9, %6 : vector<112x256xf32>
    %11 = arith.mulf %10, %6 : vector<112x256xf32>
    %12 = arith.mulf %11, %6 : vector<112x256xf32>
    %13 = arith.addf %6, %12 : vector<112x256xf32>
    %cst_8 = arith.constant 0.797884583 : f32
    %14 = vector.broadcast %cst_8 : f32 to vector<112x256xf32>
    %15 = arith.mulf %14, %13 : vector<112x256xf32>
    %16 = math.tanh %15 : vector<112x256xf32>
    %cst_9 = arith.constant 1.000000e+00 : f32
    %17 = vector.broadcast %cst_9 : f32 to vector<112x256xf32>
    %18 = arith.addf %17, %16 : vector<112x256xf32>
    %19 = arith.mulf %8, %18 : vector<112x256xf32>
    %20 = arith.truncf %19 : vector<112x256xf32> to vector<112x256xbf16>
    %c0_10 = arith.constant 0 : index
    %c0_11 = arith.constant 0 : index
    %21 = vector.load %arg4[%c0_10, %c0_11] : memref<256x128xbf16, #tpu.memory_space<vmem>>, vector<256x128xbf16>
    %cst_12 = arith.constant dense<0.000000e+00> : vector<112x128xf32>
    %22 = tpu.matmul %20, %21, %cst_12 {dimension_numbers = #tpu.dot_dimension_numbers<[1], [0], [0], [1], [0, 0, 1, 1], [], []>} : vector<112x256xbf16>, vector<256x128xbf16>, vector<112x128xf32> -> vector<112x128xf32>
    %23 = arith.addf %1, %22 : vector<112x128xf32>
    %c0_13 = arith.constant 0 : index
    %c0_14 = arith.constant 0 : index
    %24 = vector.load %arg5[%c0_13, %c0_14] : memref<1x128xf32, #tpu.memory_space<vmem>>, vector<1x128xf32>
    %25 = vector.broadcast %24 : vector<1x128xf32> to vector<112x128xf32>
    %26 = arith.addf %23, %25 : vector<112x128xf32>
    %c0_15 = arith.constant 0 : index
    %c0_16 = arith.constant 0 : index
    %27 = vector.load %arg6[%c0_15, %c0_16] : memref<112x128xf32, #tpu.memory_space<vmem>>, vector<112x128xf32>
    tpu.vector_store %arg6[%c0_15, %c0_16], %26 {strides = array<i32>} : memref<112x128xf32, #tpu.memory_space<vmem>>, vector<112x128xf32>,
    return
  }
  func.func @transform_0(%arg0: i32) -> (i32, i32) {
    %c0_i32 = arith.constant 0 : i32
    %c0_i32_0 = arith.constant 0 : i32
    return %arg0, %c0_i32 : i32, i32
  }
  func.func @transform_1(%arg0: i32) -> (i32, i32) {
    %c0_i32 = arith.constant 0 : i32
    %c0_i32_0 = arith.constant 0 : i32
    %c0_i32_1 = arith.constant 0 : i32
    return %c0_i32, %c0_i32_0 : i32, i32
  }
  func.func @transform_2(%arg0: i32) -> (i32, i32) {
    %c0_i32 = arith.constant 0 : i32
    %c0_i32_0 = arith.constant 0 : i32
    %c0_i32_1 = arith.constant 0 : i32
    return %c0_i32, %c0_i32_0 : i32, i32
  }
  func.func @transform_3(%arg0: i32) -> (i32, i32) {
    %c0_i32 = arith.constant 0 : i32
    %c0_i32_0 = arith.constant 0 : i32
    %c0_i32_1 = arith.constant 0 : i32
    return %c0_i32, %c0_i32_0 : i32, i32
  }
  func.func @transform_4(%arg0: i32) -> (i32, i32) {
    %c0_i32 = arith.constant 0 : i32
    %c0_i32_0 = arith.constant 0 : i32
    %c0_i32_1 = arith.constant 0 : i32
    return %c0_i32, %c0_i32_0 : i32, i32
  }
  func.func @transform_5(%arg0: i32) -> (i32, i32) {
    %c0_i32 = arith.constant 0 : i32
    %c0_i32_0 = arith.constant 0 : i32
    return %arg0, %c0_i32 : i32, i32
  }
}

module attributes {stable_mosaic.version = 11 : i64} {
  func.func @_siglip_mlp_kernel(%arg0: i32, %arg1: memref<112x128xbf16, #tpu.memory_space<vmem>>, %arg2: memref<128x256xbf16, #tpu.memory_space<vmem>>, %arg3: memref<1x256xf32, #tpu.memory_space<vmem>>, %arg4: memref<256x128xbf16, #tpu.memory_space<vmem>>, %arg5: memref<1x128xf32, #tpu.memory_space<vmem>>, %arg6: memref<112x128xf32, #tpu.memory_space<vmem>>) attributes {dimension_semantics = [#tpu.dimension_semantics<parallel>], iteration_bounds = array<i64: 2>, scalar_prefetch = 0 : i64, scratch_operands = 0 : i64, tpu.core_type = #tpu.core_type<tc>, window_params = [{transform_indices = @transform_0, window_bounds = array<i64: 112, 128>}, {pipeline_mode = #tpu.pipeline_mode<synchronous>, transform_indices = @transform_1, window_bounds = array<i64: 128, 256>}, {pipeline_mode = #tpu.pipeline_mode<synchronous>, transform_indices = @transform_2, window_bounds = array<i64: 1, 256>}, {pipeline_mode = #tpu.pipeline_mode<synchronous>, transform_indices = @transform_3, window_bounds = array<i64: 256, 128>}, {pipeline_mode = #tpu.pipeline_mode<synchronous>, transform_indices = @transform_4, window_bounds = array<i64: 1, 128>}, {transform_indices = @transform_5, window_bounds = array<i64: 112, 128>}]} {
    %c0 = arith.constant 0 : index
    %c0_0 = arith.constant 0 : index
    %0 = vector.load %arg1[%c0, %c0_0] : memref<112x128xbf16, #tpu.memory_space<vmem>>, vector<112x128xbf16>
    %cst = arith.constant 0.000000e+00 : f32
    %1 = vector.broadcast %cst : f32 to vector<112x128xf32>
    %c0_1 = arith.constant 0 : index
    %c0_2 = arith.constant 0 : index
    %2 = vector.load %arg2[%c0_1, %c0_2] : memref<128x256xbf16, #tpu.memory_space<vmem>>, vector<128x256xbf16>
    %cst_3 = arith.constant dense<0.000000e+00> : vector<112x256xf32>
    %3 = tpu.matmul %0, %2, %cst_3 {dimension_numbers = #tpu.dot_dimension_numbers<[1], [0], [0], [1], [0, 0, 1, 1], [], []>} : vector<112x128xbf16>, vector<128x256xbf16>, vector<112x256xf32> -> vector<112x256xf32>
    %c0_4 = arith.constant 0 : index
    %c0_5 = arith.constant 0 : index
    %4 = vector.load %arg3[%c0_4, %c0_5] : memref<1x256xf32, #tpu.memory_space<vmem>>, vector<1x256xf32>
    %5 = vector.broadcast %4 : vector<1x256xf32> to vector<112x256xf32>
    %6 = arith.addf %3, %5 : vector<112x256xf32>
    %cst_6 = arith.constant 5.000000e-01 : f32
    %7 = vector.broadcast %cst_6 : f32 to vector<112x256xf32>
    %8 = arith.mulf %7, %6 : vector<112x256xf32>
    %cst_7 = arith.constant 4.471500e-02 : f32
    %9 = vector.broadcast %cst_7 : f32 to vector<112x256xf32>
    %10 = arith.mulf %9, %6 : vector<112x256xf32>
    %11 = arith.mulf %10, %6 : vector<112x256xf32>
    %12 = arith.mulf %11, %6 : vector<112x256xf32>
    %13 = arith.addf %6, %12 : vector<112x256xf32>
    %cst_8 = arith.constant 0.797884583 : f32
    %14 = vector.broadcast %cst_8 : f32 to vector<112x256xf32>
    %15 = arith.mulf %14, %13 : vector<112x256xf32>
    %16 = math.tanh %15 : vector<112x256xf32>
    %cst_9 = arith.constant 1.000000e+00 : f32
    %17 = vector.broadcast %cst_9 : f32 to vector<112x256xf32>
    %18 = arith.addf %17, %16 : vector<112x256xf32>
    %19 = arith.mulf %8, %18 : vector<112x256xf32>
    %20 = arith.truncf %19 : vector<112x256xf32> to vector<112x256xbf16>
    %c0_10 = arith.constant 0 : index
    %c0_11 = arith.constant 0 : index
    %21 = vector.load %arg4[%c0_10, %c0_11] : memref<256x128xbf16, #tpu.memory_space<vmem>>, vector<256x128xbf16>
    %cst_12 = arith.constant dense<0.000000e+00> : vector<112x128xf32>
    %22 = tpu.matmul %20, %21, %cst_12 {dimension_numbers = #tpu.dot_dimension_numbers<[1], [0], [0], [1], [0, 0, 1, 1], [], []>} : vector<112x256xbf16>, vector<256x128xbf16>, vector<112x128xf32> -> vector<112x128xf32>
    %23 = arith.addf %1, %22 : vector<112x128xf32>
    %c0_13 = arith.constant 0 : index
    %c0_14 = arith.constant 0 : index
    %24 = vector.load %arg5[%c0_13, %c0_14] : memref<1x128xf32, #tpu.memory_space<vmem>>, vector<1x128xf32>
    %25 = vector.broadcast %24 : vector<1x128xf32> to vector<112x128xf32>
    %26 = arith.addf %23, %25 : vector<112x128xf32>
    %c0_15 = arith.constant 0 : index
    %c0_16 = arith.constant 0 : index
    %27 = vector.load %arg6[%c0_15, %c0_16] : memref<112x128xf32, #tpu.memory_space<vmem>>, vector<112x128xf32>
    tpu.vector_store %arg6[%c0_15, %c0_16], %26 {strides = array<i32>} : memref<112x128xf32, #tpu.memory_space<vmem>>, vector<112x128xf32>,
    return
  }
  func.func @transform_0(%arg0: i32) -> (i32, i32) {
    %c0_i32 = arith.constant 0 : i32
    %c0_i32_0 = arith.constant 0 : i32
    return %arg0, %c0_i32 : i32, i32
  }
  func.func @transform_1(%arg0: i32) -> (i32, i32) {
    %c0_i32 = arith.constant 0 : i32
    %c0_i32_0 = arith.constant 0 : i32
    %c0_i32_1 = arith.constant 0 : i32
    return %c0_i32, %c0_i32_0 : i32, i32
  }
  func.func @transform_2(%arg0: i32) -> (i32, i32) {
    %c0_i32 = arith.constant 0 : i32
    %c0_i32_0 = arith.constant 0 : i32
    %c0_i32_1 = arith.constant 0 : i32
    return %c0_i32, %c0_i32_0 : i32, i32
  }
  func.func @transform_3(%arg0: i32) -> (i32, i32) {
    %c0_i32 = arith.constant 0 : i32
    %c0_i32_0 = arith.constant 0 : i32
    %c0_i32_1 = arith.constant 0 : i32
    return %c0_i32, %c0_i32_0 : i32, i32
  }
  func.func @transform_4(%arg0: i32) -> (i32, i32) {
    %c0_i32 = arith.constant 0 : i32
    %c0_i32_0 = arith.constant 0 : i32
    %c0_i32_1 = arith.constant 0 : i32
    return %c0_i32, %c0_i32_0 : i32, i32
  }
  func.func @transform_5(%arg0: i32) -> (i32, i32) {
    %c0_i32 = arith.constant 0 : i32
    %c0_i32_0 = arith.constant 0 : i32
    return %arg0, %c0_i32 : i32, i32
  }
}

</mosaic_0001>

<bundles_post_ra>
// kernel: siglip_mlp.1
= control target key start
LH: loop header
LB: loop body
LE: loop exit
PB: predicated region body
PF: predicated region fallthrough
CT: control target
= control target key end

     0   :  { %s1314_s18 = smov 0   ;;  %s1697_s0 = inlined_call_operand.vmem [shape: bf16[224,128], index: 0, kind: input, shape index: {}]   ;;  %s1698_s1 = inlined_call_operand.vmem [shape: bf16[128,256], index: 1, kind: input, shape index: {}]   ;;  %s1699_s2 = inlined_call_operand.vmem [shape: f32[1,256], index: 2, kind: input, shape index: {}]   ;;  %s1700_s3 = inlined_call_operand.vmem [shape: bf16[256,128], index: 3, kind: input, shape index: {}]   ;;  %s1701_s4 = inlined_call_operand.vmem [shape: f32[1,128], index: 4, kind: input, shape index: {}]   ;;  %s1702_s5 = inlined_call_operand.vmem [shape: f32[224,128], index: 5, kind: output, shape index: {}]  }
   0x1 LB: > { %s1056_s19 = sadd.s32 4294967295, %s1281_s18   ;;  %p1060_p0 = scmp.ge.s32.totalorder %s1281_s18, 1  ;;  %s1281_s18 = sphi %s1314_s18, %s15_s18  }
   0x2   : > { %p188_p1 = scmp.lt.s32.totalorder %s1281_s18, 3 }
   0x4   : > { %p189_p2 = pnand %p1060_p0, %p188_p1 }
   0x5   : > { %v1172_v0 = vld [vmem:[%s1698_s1 + $0x4] ss:$8 sps:$4 sm:$0xff] (!%p189_p2)   ;;  %s216_s22 = smul.u32 (!%p189_p2), 14, %s1056_s19  ;;  %v1174_v1 = vld [vmem:[%s1698_s1] ss:$8 sps:$4 sm:$0xff] (!%p189_p2)   ;;  %v1283_v2 = vmov (!%p189_p2), 0   ;;  %v261_v40 = vlaneseq (!%p189_p2) }
   0x6   : > { %192 = sbr.rel (%p189_p2) target bundleno = 563 (0x233), region = 40  ;;  %425 = vmatprep.mubr.bf16.mxu0 (!%p189_p2), %v1283_v2  ;;  %393 = vmatprep.subr.bf16.mxu0 (!%p189_p2), %v1172_v0  ;;  %v1175_v3 = vld [vmem:[%s1698_s1 + $0x14] ss:$8 sps:$4 sm:$0xff] (!%p189_p2)   ;;  %v1177_v4 = vld [vmem:[%s1698_s1 + $0x10] ss:$8 sps:$4 sm:$0xff] (!%p189_p2)   ;;  %v1203_v24 = vld [vmem:[%s1700_s3 + $0x40] sm:$0xff] (!%p189_p2)  }
   0x7   : > { %p217_p3 = scmp.lt.s32.totalorder (!%p189_p2), %s216_s22, 27  ;;  %394 = vmatpush1.bf16.msra.mxu0 (!%p189_p2), %v1174_v1  ;;  %v1178_v5 = vld [vmem:[%s1698_s1 + $0x24] ss:$8 sps:$4 sm:$0xff] (!%p189_p2)   ;;  %v1180_v6 = vld [vmem:[%s1698_s1 + $0x20] ss:$8 sps:$4 sm:$0xff] (!%p189_p2)   ;;  %1105 = vmatprep.subr.bf16.mxu1 (!%p189_p2), %v1203_v24  ;;  %v1207_v28 = vld [vmem:[%s1700_s3 + $0x50] sm:$0xff] (!%p189_p2)  }
   0x8   : > { %395 = vmatprep.subr.bf16.mxu0 (!%p189_p2), %v1175_v3  ;;  %v1181_v7 = vld [vmem:[%s1698_s1 + $0x34] ss:$8 sps:$4 sm:$0xff] (!%p189_p2)   ;;  %v1183_v8 = vld [vmem:[%s1698_s1 + $0x30] ss:$8 sps:$4 sm:$0xff] (!%p189_p2)   ;;  %v1184_v9 = vld [vmem:[%s1698_s1 + $0x44] ss:$8 sps:$4 sm:$0xff] (!%p189_p2)  }
   0x9   : > { %v1186_v10 = vld [vmem:[%s1698_s1 + $0x40] ss:$8 sps:$4 sm:$0xff] (!%p189_p2)   ;;  %v1187_v11 = vld [vmem:[%s1698_s1 + $0x54] ss:$8 sps:$4 sm:$0xff] (!%p189_p2)   ;;  %v1189_v12 = vld [vmem:[%s1698_s1 + $0x50] ss:$8 sps:$4 sm:$0xff] (!%p189_p2)  }
   0xa   : > { %v1190_v13 = vld [vmem:[%s1698_s1 + $0x64] ss:$8 sps:$4 sm:$0xff] (!%p189_p2)   ;;  %v1192_v14 = vld [vmem:[%s1698_s1 + $0x60] ss:$8 sps:$4 sm:$0xff] (!%p189_p2)   ;;  %v1193_v15 = vld [vmem:[%s1698_s1 + $0x74] ss:$8 sps:$4 sm:$0xff] (!%p189_p2)  }
   0xb   : > { %396 = vmatpush1.bf16.msra.mxu0 (!%p189_p2), %v1177_v4  ;;  %v1195_v16 = vld [vmem:[%s1698_s1 + $0x70] ss:$8 sps:$4 sm:$0xff] (!%p189_p2)   ;;  %v1204_v25 = vld [vmem:[%s1700_s3] sm:$0xff] (!%p189_p2)   ;;  %v1205_v26 = vld [vmem:[%s1700_s3 + $0x48] sm:$0xff] (!%p189_p2)   ;;  %v262_v41 = vshrl.u32 (!%p189_p2), %v261_v40, 7 }
   0xc   : > { %397 = vmatprep.subr.bf16.mxu0 (!%p189_p2), %v1178_v5  ;;  %1106 = vmatpush3.bf16.msra.mxu1 (!%p189_p2), %v1204_v25  ;;  %v1206_v27 = vld [vmem:[%s1700_s3 + $0x8] sm:$0xff] (!%p189_p2)   ;;  %v1208_v29 = vld [vmem:[%s1700_s3 + $0x10] sm:$0xff] (!%p189_p2)   ;;  %v1209_v30 = vld [vmem:[%s1700_s3 + $0x58] sm:$0xff] (!%p189_p2)  }
   0xd   : > { %s1704_s22 = smov (!%p217_p3, %s216_s22), 27  ;;  %1107 = vmatprep.subr.bf16.mxu1 %v1205_v26  ;;  %v1210_v31 = vld [vmem:[%s1700_s3 + $0x18] sm:$0xff]   ;;  %v1211_v32 = vld [vmem:[%s1700_s3 + $0x60] sm:$0xff]   ;;  %v1213_v34 = vld [vmem:[%s1700_s3 + $0x68] sm:$0xff]   ;;  %v263_v42 = vsub.s32 0, %v262_v41  ;;  %v267_v44 = vsub.s32 1, %v262_v41 }
   0xe   : > { %s1061_s6 = sshll.u32 %s1704_s22, 2  ;;  %v1212_v33 = vld [vmem:[%s1700_s3 + $0x20] sm:$0xff]   ;;  %v1214_v35 = vld [vmem:[%s1700_s3 + $0x28] sm:$0xff]   ;;  %v1215_v36 = vld [vmem:[%s1700_s3 + $0x70] sm:$0xff]   ;;  %s1062_s21 = sshll.u32 %s1704_s22, 3 }
   0xf   : > { %s1349_s13 = scalar_lea.vmem %s1697_s0, %s1061_s6  ;;  %398 = vmatpush1.bf16.msra.mxu0 %v1180_v6  ;;  %v1216_v37 = vld [vmem:[%s1700_s3 + $0x30] sm:$0xff]   ;;  %v1217_v38 = vld [vmem:[%s1700_s3 + $0x78] sm:$0xff]   ;;  %v259_v43 = vld [vmem:[%s1699_s2] sm:$0x3]  ;;  %s1664_s27 = scalar_lea.vmem %s1702_s5, %s1062_s21 }
  0x10   : > { %399 = vmatprep.subr.bf16.mxu0 %v1181_v7  ;;  %v1196_v17 = vld [vmem:[%s1349_s13] sm:$0xff]   ;;  %v1197_v18 = vld [vmem:[%s1349_s13 + $0x8] sm:$0xff]   ;;  %v1198_v19 = vld [vmem:[%s1349_s13 + $0x10] sm:$0xff]   ;;  %1108 = vmatpush3.bf16.msra.mxu1 %v1206_v27  ;;  %v1436_v45 = vrot.slane %v259_v43, %v263_v42  ;;  %v1438_v46 = vrot.slane %v259_v43, %v267_v44 }
  0x11   : > { %v1199_v20 = vld [vmem:[%s1349_s13 + $0x18] sm:$0xff]   ;;  %v1200_v21 = vld [vmem:[%s1349_s13 + $0x20] sm:$0xff]   ;;  %v1201_v22 = vld [vmem:[%s1349_s13 + $0x28] sm:$0xff]   ;;  %1109 = vmatprep.subr.bf16.mxu1 %v1207_v28 }
  0x12   : > { %v1202_v23 = vld [vmem:[%s1349_s13 + $0x30] sm:$0xff]   ;;  %v1218_v39 = vld [vmem:[%s1700_s3 + $0x38] sm:$0xff]  }
  0x13   : > { %400 = vmatpush1.bf16.msra.mxu0 %v1183_v8 }
  0x14   : > { %401 = vmatprep.subr.bf16.mxu0 %v1184_v9  ;;  %1110 = vmatpush3.bf16.msra.mxu1 %v1208_v29 }
  0x15   : > { %1111 = vmatprep.subr.bf16.mxu1 %v1209_v30 }
  0x17   : > { %402 = vmatpush1.bf16.msra.mxu0 %v1186_v10 }
  0x18   : > { %403 = vmatprep.subr.bf16.mxu0 %v1187_v11  ;;  %1112 = vmatpush3.bf16.msra.mxu1 %v1210_v31 }
  0x19   : > { %1113 = vmatprep.subr.bf16.mxu1 %v1211_v32 }
  0x1b   : > { %404 = vmatpush1.bf16.msra.mxu0 %v1189_v12 }
  0x1c   : > { %405 = vmatprep.subr.bf16.mxu0 %v1190_v13  ;;  %1114 = vmatpush3.bf16.msra.mxu1 %v1212_v33 }
  0x1d   : > { %1115 = vmatprep.subr.bf16.mxu1 %v1213_v34 }
  0x1f   : > { %406 = vmatpush1.bf16.msra.mxu0 %v1192_v14 }
  0x20   : > { %407 = vmatprep.subr.bf16.mxu0 %v1193_v15  ;;  %1116 = vmatpush3.bf16.msra.mxu1 %v1214_v35 }
  0x21   : > { %1117 = vmatprep.subr.bf16.mxu1 %v1215_v36 }
  0x23   : > { %408 = vmatpush1.bf16.msra.mxu0 %v1195_v16 }
  0x24   : > { %1118 = vmatpush3.bf16.msra.mxu1 %v1216_v37 }
  0x25   : > { %1119 = vmatprep.subr.bf16.mxu1 %v1217_v38 }
  0x26   : > { %426 = vmatmul.mubr.bf16.vlgmr.msra.gmra.mrb[0].mxu0 %v1196_v17 }
  0x27   : > { %435 = vmatprep.mubr.bf16.mxu0 %v1283_v2 }
  0x28   : > { %1120 = vmatpush3.bf16.msra.mxu1 %v1218_v39 }
  0x2e   : > { %436 = vmatmul.mubr.bf16.gmra.mrb[4].mxu0 %v1197_v18 }
  0x2f   : > { %445 = vmatprep.mubr.bf16.mxu0 %v1283_v2 }
  0x36   : > { %446 = vmatmul.mubr.bf16.gmra.mrb[8].mxu0 %v1198_v19 }
  0x37   : > { %455 = vmatprep.mubr.bf16.mxu0 %v1283_v2 }
  0x3e   : > { %456 = vmatmul.mubr.bf16.gmra.mrb[12].mxu0 %v1199_v20 }
  0x3f   : > { %465 = vmatprep.mubr.bf16.mxu0 %v1283_v2 }
  0x46   : > { %466 = vmatmul.mubr.bf16.gmra.mrb[16].mxu0 %v1200_v21 }
  0x47   : > { %475 = vmatprep.mubr.bf16.mxu0 %v1283_v2 }
  0x4e   : > { %476 = vmatmul.mubr.bf16.gmra.mrb[20].mxu0 %v1201_v22 }
  0x4f   : > { %485 = vmatprep.mubr.bf16.mxu0 %v1283_v2 }
  0x56   : > { %486 = vmatmul.mubr.bf16.gmra.mrb[24].mxu0 %v1202_v23 }
  0xf9   : > { %v427_v47 = vpop.f32.mrb[0].mxu0 }
  0xfa   : > { %v428_v48 = vadd.f32 %v427_v47, %v1436_v45  ;;  %v429_v49 = vpop.f32.mrb[1].mxu0 }
  0xfb   : > { %v1442_v50 = vadd.f32 %v429_v49, %v1438_v46  ;;  %v431_v51 = vpop.f32.mrb[2].mxu0 }
  0xfc   : > { %v524_v52 = vmul.f32 0.044715, %v428_v48  ;;  %v1445_v53 = vadd.f32 %v431_v51, %v1436_v45  ;;  %v433_v54 = vpop.f32.mrb[3].mxu0  ;;  %v496_v39 = vmul.f32 0.5, %v428_v48 }
  0xfd   : > { %v525_v55 = vmul.f32 0.044715, %v1442_v50  ;;  %v1449_v56 = vadd.f32 %v433_v54, %v1438_v46  ;;  %v497_v49 = vmul.f32 0.5, %v1442_v50 }
  0xfe   : > { %v552_v57 = vmul.f32 %v524_v52, %v428_v48  ;;  %v526_v58 = vmul.f32 0.044715, %v1445_v53 }
  0xff   : > { %v527_v59 = vmul.f32 0.044715, %v1449_v56  ;;  %v553_v60 = vmul.f32 %v525_v55, %v1442_v50 }
 0x100   : > { %v580_v61 = vmul.f32 %v552_v57, %v428_v48  ;;  %v554_v62 = vmul.f32 %v526_v58, %v1445_v53 }
 0x101   : > { %v437_v63 = vpop.f32.mrb[4].mxu0  ;;  %v555_v0 = vmul.f32 %v527_v59, %v1449_v56  ;;  %v581_v1 = vmul.f32 %v553_v60, %v1442_v50  ;;  %v499_v59 = vmul.f32 0.5, %v1449_v56  ;;  %v498_v60 = vmul.f32 0.5, %v1445_v53 }
 0x102   : > { %v582_v2 = vmul.f32 %v554_v62, %v1445_v53  ;;  %v1459_v3 = vadd.f32 %v437_v63, %v1436_v45  ;;  %v439_v4 = vpop.f32.mrb[5].mxu0  ;;  %v608_v5 = vadd.f32 %v580_v61, %v428_v48 }
 0x103   : > { %v440_v6 = vadd.f32 %v439_v4, %v1438_v46  ;;  %v441_v7 = vpop.f32.mrb[6].mxu0  ;;  %v583_v8 = vmul.f32 %v555_v0, %v1449_v56  ;;  %v609_v9 = vadd.f32 %v581_v1, %v1442_v50 }
 0x104   : > { %v528_v10 = vmul.f32 0.044715, %v1459_v3  ;;  %v1466_v11 = vadd.f32 %v441_v7, %v1436_v45  ;;  %v443_v12 = vpop.f32.mrb[7].mxu0  ;;  %v610_v13 = vadd.f32 %v582_v2, %v1445_v53  ;;  %v636_v14 = vmul.f32 0.7978846, %v608_v5 }
 0x105   : > { %v529_v15 = vmul.f32 0.044715, %v440_v6  ;;  %v444_v16 = vadd.f32 %v443_v12, %v1438_v46  ;;  %v611_v17 = vadd.f32 %v583_v8, %v1449_v56  ;;  %v637_v18 = vmul.f32 0.7978846, %v609_v9 }
 0x106   : > { %v556_v19 = vmul.f32 %v528_v10, %v1459_v3  ;;  %v530_v20 = vmul.f32 0.044715, %v1466_v11  ;;  %v638_v21 = vmul.f32 0.7978846, %v610_v13  ;;  %1219 = vtanh.f32 %v636_v14 }
 0x107   : > { %v557_v22 = vmul.f32 %v529_v15, %v440_v6  ;;  %v531_v23 = vmul.f32 0.044715, %v444_v16  ;;  %v639_v24 = vmul.f32 0.7978846, %v611_v17  ;;  %1221 = vtanh.f32 %v637_v18 }
 0x108   : > { %v584_v25 = vmul.f32 %v556_v19, %v1459_v3  ;;  %v558_v26 = vmul.f32 %v530_v20, %v1466_v11  ;;  %1223 = vtanh.f32 %v638_v21  ;;  %v1498_v0 = vmul.f32 0.5, %v440_v6 }
 0x109   : > { %v585_v27 = vmul.f32 %v557_v22, %v440_v6  ;;  %v559_v28 = vmul.f32 %v531_v23, %v444_v16  ;;  %v447_v29 = vpop.f32.mrb[8].mxu0  ;;  %1225 = vtanh.f32 %v639_v24  ;;  %v503_v7 = vmul.f32 0.5, %v444_v16 }
 0x10a   : > { %v586_v30 = vmul.f32 %v558_v26, %v1466_v11  ;;  %v449_v31 = vpop.f32.mrb[9].mxu0  ;;  %v612_v36 = vadd.f32 %v584_v25, %v1459_v3  ;;  %v1481_v37 = vadd.f32 %v447_v29, %v1436_v45  ;;  %v502_v23 = vmul.f32 0.5, %v1466_v11 }
 0x10b   : > { %v587_v32 = vmul.f32 %v559_v28, %v444_v16  ;;  %v1477_v33 = vadd.f32 %v449_v31, %v1438_v46  ;;  %v451_v34 = vpop.f32.mrb[10].mxu0  ;;  %v613_v35 = vadd.f32 %v585_v27, %v440_v6 }
 0x10c   : > { %v453_v38 = vpop.f32.mrb[11].mxu0  ;;  %v614_v40 = vadd.f32 %v586_v30, %v1466_v11  ;;  %v1489_v47 = vadd.f32 %v451_v34, %v1436_v45  ;;  %v640_v51 = vmul.f32 0.7978846, %v612_v36  ;;  %v532_v58 = vmul.f32 0.044715, %v1481_v37 }
 0x10d   : > { %v533_v41 = vmul.f32 0.044715, %v1477_v33  ;;  %v1486_v42 = vadd.f32 %v453_v38, %v1438_v46  ;;  %v615_v43 = vadd.f32 %v587_v32, %v444_v16  ;;  %v641_v44 = vmul.f32 0.7978846, %v613_v35 }
 0x10e   : > { %v642_v52 = vmul.f32 0.7978846, %v614_v40  ;;  %v534_v56 = vmul.f32 0.044715, %v1489_v47  ;;  %v560_v6 = vmul.f32 %v532_v58, %v1481_v37  ;;  %v500_v16 = vmul.f32 0.5, %v1459_v3 }
 0x10f   : > { %v561_v54 = vmul.f32 %v533_v41, %v1477_v33  ;;  %v535_v48 = vmul.f32 0.044715, %v1486_v42  ;;  %v643_v55 = vmul.f32 0.7978846, %v615_v43  ;;  %1227 = vtanh.f32 %v641_v44 }
 0x110   : > { %v1220_v57 = vpop.eup %1219  ;;  %1229 = vtanh.f32 %v640_v51  ;;  %v562_v25 = vmul.f32 %v534_v56, %v1489_v47  ;;  %v1520_v3 = vmul.f32 0.5, %v1481_v37  ;;  %v588_v34 = vmul.f32 %v560_v6, %v1481_v37 }
 0x111   : > { %v1222_v61 = vpop.eup %1221  ;;  %v563_v62 = vmul.f32 %v535_v48, %v1486_v42  ;;  %v457_v50 = vpop.f32.mrb[12].mxu0  ;;  %v692_v63 = vadd.f32 1.0, %v1220_v57  ;;  %1231 = vtanh.f32 %v643_v55  ;;  %v589_v2 = vmul.f32 %v561_v54, %v1477_v33 }
 0x112   : > { %v1224_v1 = vpop.eup %1223  ;;  %v459_v4 = vpop.f32.mrb[13].mxu0  ;;  %v693_v5 = vadd.f32 1.0, %v1222_v61  ;;  %1233 = vtanh.f32 %v642_v52  ;;  %v1508_v13 = vadd.f32 %v457_v50, %v1436_v45  ;;  %v1533_v44 = vmul.f32 0.5, %v1477_v33 }
 0x113   : > { %v1226_v8 = vpop.eup %1225  ;;  %v591_v53 = vmul.f32 %v563_v62, %v1486_v42  ;;  %v1504_v9 = vadd.f32 %v459_v4, %v1438_v46  ;;  %v461_v10 = vpop.f32.mrb[14].mxu0  ;;  %v694_v12 = vadd.f32 1.0, %v1224_v1  ;;  %v720_v19 = vmul.f32 %v692_v63, %v496_v39 }
 0x114   : > { %v463_v14 = vpop.f32.mrb[15].mxu0  ;;  %v695_v15 = vadd.f32 1.0, %v1226_v8  ;;  %v721_v21 = vmul.f32 %v693_v5, %v497_v49  ;;  %v617_v24 = vadd.f32 %v589_v2, %v1477_v33  ;;  %v536_v28 = vmul.f32 0.044715, %v1508_v13 }
 0x115   : > { %v537_v17 = vmul.f32 0.044715, %v1504_v9  ;;  %v1513_v18 = vadd.f32 %v463_v14, %v1438_v46  ;;  %v722_v20 = vmul.f32 %v694_v12, %v498_v60  ;;  %v619_v27 = vadd.f32 %v591_v53, %v1486_v42 }
 0x116   : > { %v723_v22 = vmul.f32 %v695_v15, %v499_v59  ;;  %v645_v31 = vmul.f32 0.7978846, %v617_v24  ;;  %v1527_v35 = vadd.f32 %v461_v10, %v1436_v45  ;;  %v590_v51 = vmul.f32 %v562_v25, %v1489_v47 }
 0x117   : > { %v748_v26 = vpack.c.bf16 %v722_v20, %v720_v19  ;;  %v539_v29 = vmul.f32 0.044715, %v1513_v18  ;;  %v565_v11 = vmul.f32 %v537_v17, %v1504_v9  ;;  %v647_v38 = vmul.f32 0.7978846, %v619_v27 }
 0x118   : > { %v749_v30 = vpack.c.bf16 %v723_v22, %v721_v21  ;;  %1235 = vtanh.f32 %v645_v31  ;;  %v564_v57 = vmul.f32 %v536_v28, %v1508_v13  ;;  %v538_v62 = vmul.f32 0.044715, %v1527_v35 }
 0x119   : > { %v1228_v32 = vpop.eup %1227  ;;  %v467_v36 = vpop.f32.mrb[16].mxu0  ;;  %1237 = vtanh.f32 %v647_v38  ;;  %v567_v58 = vmul.f32 %v539_v29, %v1513_v18  ;;  %v593_v61 = vmul.f32 %v565_v11, %v1504_v9  ;;  %v616_v5 = vadd.f32 %v588_v34, %v1481_v37 }
 0x11a   : > { %v1230_v39 = vpop.eup %1229  ;;  %v1530_v40 = vadd.f32 %v467_v36, %v1436_v45  ;;  %v469_v41 = vpop.f32.mrb[17].mxu0  ;;  %929 = vmatprep.mubr.bf16.mxu1 %v749_v30  ;;  %v697_v43 = vadd.f32 1.0, %v1228_v32  ;;  %v618_v10 = vadd.f32 %v590_v51, %v1489_v47  ;;  %v566_v17 = vmul.f32 %v538_v62, %v1527_v35 }
 0x11b   : > { %v1232_v49 = vpop.eup %1231  ;;  %v1537_v52 = vadd.f32 %v469_v41, %v1438_v46  ;;  %v471_v54 = vpop.f32.mrb[18].mxu0  ;;  %930 = vmatmul.mubr.bf16.vlgmr.msra.gmra.mrb[0].mxu1 %v748_v26  ;;  %v696_v48 = vadd.f32 1.0, %v1230_v39  ;;  %v595_v12 = vmul.f32 %v567_v58, %v1513_v18  ;;  %v644_v15 = vmul.f32 0.7978846, %v616_v5 }
 0x11c   : > { %v1234_v55 = vpop.eup %1233  ;;  %v1542_v59 = vadd.f32 %v471_v54, %v1436_v45  ;;  %v473_v33 = vpop.f32.mrb[19].mxu0  ;;  %v699_v60 = vadd.f32 1.0, %v1232_v49  ;;  %v540_v1 = vmul.f32 0.044715, %v1530_v40  ;;  %v725_v2 = vmul.f32 %v697_v43, %v1498_v0 }
 0x11d   : > { %v1547_v50 = vadd.f32 %v473_v33, %v1438_v46  ;;  %v698_v63 = vadd.f32 1.0, %v1234_v55  ;;  %v541_v8 = vmul.f32 0.044715, %v1537_v52  ;;  %v724_v56 = vmul.f32 %v696_v48, %v500_v16 }
 0x11e   : > { %v727_v4 = vmul.f32 %v699_v60, %v503_v7  ;;  %v542_v6 = vmul.f32 0.044715, %v1542_v59  ;;  %v646_v20 = vmul.f32 0.7978846, %v618_v10  ;;  %v592_v37 = vmul.f32 %v564_v57, %v1508_v13 }
 0x11f   : > { %v726_v53 = vmul.f32 %v698_v63, %v502_v23  ;;  %v543_v19 = vmul.f32 0.044715, %v1547_v50  ;;  %v568_v16 = vmul.f32 %v540_v1, %v1530_v40  ;;  %v507_v22 = vmul.f32 0.5, %v1486_v42 }
 0x120   : > { %v751_v14 = vpack.c.bf16 %v727_v4, %v725_v2  ;;  %1239 = vtanh.f32 %v644_v15  ;;  %v569_v23 = vmul.f32 %v541_v8, %v1537_v52  ;;  %v506_v30 = vmul.f32 0.5, %v1489_v47 }
 0x121   : > { %v477_v0 = vpop.f32.mrb[20].mxu0  ;;  %v750_v7 = vpack.c.bf16 %v726_v53, %v724_v56  ;;  %1241 = vtanh.f32 %v646_v20  ;;  %v621_v42 = vadd.f32 %v593_v61, %v1504_v9  ;;  %v623_v31 = vadd.f32 %v595_v12, %v1513_v18 }
 0x122   : > { %v479_v21 = vpop.f32.mrb[21].mxu0  ;;  %937 = vmatprep.mubr.bf16.mxu1 %v751_v14  ;;  %v1563_v24 = vadd.f32 %v477_v0, %v1436_v45  ;;  %v1236_v27 = vpop.eup %1235  ;;  %v594_v34 = vmul.f32 %v566_v17, %v1527_v35  ;;  %v570_v11 = vmul.f32 %v542_v6, %v1542_v59  ;;  %v571_v36 = vmul.f32 %v543_v19, %v1547_v50 }
 0x123   : > { %v1566_v25 = vadd.f32 %v479_v21, %v1438_v46  ;;  %v481_v26 = vpop.f32.mrb[22].mxu0  ;;  %938 = vmatmul.mubr.bf16.gmra.mrb[4].mxu1 %v750_v7  ;;  %v1238_v32 = vpop.eup %1237  ;;  %v701_v38 = vadd.f32 1.0, %v1236_v27  ;;  %v1578_v39 = vmul.f32 %v568_v16, %v1530_v40  ;;  %v649_v47 = vmul.f32 0.7978846, %v621_v42 }
 0x124   : > { %v1569_v28 = vadd.f32 %v481_v26, %v1436_v45  ;;  %v483_v29 = vpop.f32.mrb[23].mxu0  ;;  %v703_v43 = vadd.f32 1.0, %v1238_v32  ;;  %v597_v49 = vmul.f32 %v569_v23, %v1537_v52  ;;  %v544_v51 = vmul.f32 0.044715, %v1563_v24 }
 0x125   : > { %v1581_v41 = vadd.f32 %v483_v29, %v1438_v46  ;;  %v545_v54 = vmul.f32 0.044715, %v1566_v25  ;;  %v651_v48 = vmul.f32 0.7978846, %v623_v31  ;;  %v729_v57 = vmul.f32 %v701_v38, %v1533_v44 }
 0x126   : > { %v546_v55 = vmul.f32 0.044715, %v1569_v28  ;;  %v731_v58 = vmul.f32 %v703_v43, %v507_v22  ;;  %1243 = vtanh.f32 %v649_v47  ;;  %v598_v33 = vmul.f32 %v570_v11, %v1542_v59 }
 0x127   : > { %v599_v60 = vmul.f32 %v571_v36, %v1547_v50  ;;  %v509_v62 = vmul.f32 0.5, %v1504_v9  ;;  %1245 = vtanh.f32 %v651_v48  ;;  %v547_v63 = vmul.f32 0.044715, %v1581_v41 }
 0x128   : > { %v753_v4 = vpack.c.bf16 %v731_v58, %v729_v57  ;;  %v620_v5 = vadd.f32 %v592_v37, %v1508_v13  ;;  %v572_v44 = vmul.f32 %v544_v51, %v1563_v24  ;;  %v511_v53 = vmul.f32 0.5, %v1513_v18 }
 0x129   : > { %v487_v61 = vpop.f32.mrb[24].mxu0  ;;  %v622_v9 = vadd.f32 %v594_v34, %v1527_v35  ;;  %v573_v12 = vmul.f32 %v545_v54, %v1566_v25  ;;  %v574_v6 = vmul.f32 %v546_v55, %v1569_v28  ;;  %v575_v37 = vmul.f32 %v547_v63, %v1581_v41 }
 0x12a   : > { %v1593_v1 = vadd.f32 %v487_v61, %v1436_v45  ;;  %v489_v2 = vpop.f32.mrb[25].mxu0  ;;  %v1240_v10 = vpop.eup %1239  ;;  %945 = vmatprep.mubr.bf16.mxu1 %v753_v4  ;;  %v648_v17 = vmul.f32 0.7978846, %v620_v5  ;;  %v600_v22 = vmul.f32 %v572_v44, %v1563_v24  ;;  %v508_v23 = vmul.f32 0.5, %v1508_v13 }
 0x12b   : > { %v1598_v8 = vadd.f32 %v489_v2, %v1438_v46  ;;  %v491_v56 = vpop.f32.mrb[26].mxu0  ;;  %v1242_v19 = vpop.eup %1241  ;;  %v700_v7 = vadd.f32 1.0, %v1240_v10  ;;  %v650_v18 = vmul.f32 0.7978846, %v622_v9  ;;  %v625_v29 = vadd.f32 %v597_v49, %v1537_v52 }
 0x12c   : > { %v1605_v14 = vadd.f32 %v491_v56, %v1436_v45  ;;  %v493_v15 = vpop.f32.mrb[27].mxu0  ;;  %v548_v16 = vmul.f32 0.044715, %v1593_v1  ;;  %v702_v21 = vadd.f32 1.0, %v1242_v19  ;;  %1247 = vtanh.f32 %v648_v17 }
 0x12d   : > { %v549_v0 = vmul.f32 0.044715, %v1598_v8  ;;  %v1609_v20 = vadd.f32 %v493_v15, %v1438_v46  ;;  %1249 = vtanh.f32 %v650_v18  ;;  %v728_v27 = vmul.f32 %v700_v7, %v1520_v3 }
 0x12e   : > { %v550_v26 = vmul.f32 0.044715, %v1605_v14  ;;  %v730_v46 = vmul.f32 %v702_v21, %v506_v30  ;;  %v601_v42 = vmul.f32 %v573_v12, %v1566_v25  ;;  %v602_v31 = vmul.f32 %v574_v6, %v1569_v28 }
 0x12f   : > { %v551_v45 = vmul.f32 0.044715, %v1609_v20  ;;  %v577_v32 = vmul.f32 %v549_v0, %v1598_v8  ;;  %v627_v34 = vadd.f32 %v599_v60, %v1547_v50  ;;  %v603_v36 = vmul.f32 %v575_v37, %v1581_v41 }
 0x130   : > { %v1244_v11 = vpop.eup %1243  ;;  %v576_v13 = vmul.f32 %v548_v16, %v1593_v1  ;;  %v752_v38 = vpack.c.bf16 %v730_v46, %v728_v27  ;;  %v653_v43 = vmul.f32 0.7978846, %v625_v29  ;;  %v624_v51 = vadd.f32 %v1578_v39, %v1530_v40 }
 0x131   : > { %v1246_v47 = vpop.eup %1245  ;;  %v579_v3 = vmul.f32 %v551_v45, %v1609_v20  ;;  %v705_v30 = vadd.f32 1.0, %v1244_v11  ;;  %v655_v49 = vmul.f32 0.7978846, %v627_v34  ;;  %v578_v54 = vmul.f32 %v550_v26, %v1605_v14 }
 0x132   : > { %946 = vmatmul.mubr.bf16.gmra.mrb[8].mxu1 %v752_v38  ;;  %v707_v48 = vadd.f32 1.0, %v1246_v47  ;;  %1251 = vtanh.f32 %v653_v43  ;;  %v626_v55 = vadd.f32 %v598_v33, %v1542_v59  ;;  %v605_v57 = vmul.f32 %v577_v32, %v1598_v8 }
 0x133   : > { %v733_v58 = vmul.f32 %v705_v30, %v509_v62  ;;  %1253 = vtanh.f32 %v655_v49  ;;  %v652_v60 = vmul.f32 0.7978846, %v624_v51  ;;  %v629_v2 = vadd.f32 %v601_v42, %v1566_v25 }
 0x134   : > { %v735_v61 = vmul.f32 %v707_v48, %v511_v53  ;;  %v654_v63 = vmul.f32 0.7978846, %v626_v55  ;;  %v631_v4 = vadd.f32 %v603_v36, %v1581_v41  ;;  %v607_v39 = vmul.f32 %v579_v3, %v1609_v20 }
 0x135   : > { %v510_v5 = vmul.f32 0.5, %v1527_v35  ;;  %1255 = vtanh.f32 %v652_v60  ;;  %v628_v44 = vadd.f32 %v600_v22, %v1563_v24  ;;  %v657_v9 = vmul.f32 0.7978846, %v629_v2 }
 0x136   : > { %v1248_v56 = vpop.eup %1247  ;;  %v755_v33 = vpack.c.bf16 %v735_v61, %v733_v58  ;;  %1257 = vtanh.f32 %v654_v63  ;;  %v659_v62 = vmul.f32 0.7978846, %v631_v4  ;;  %v604_v53 = vmul.f32 %v576_v13, %v1593_v1 }
 0x137   : > { %v1250_v10 = vpop.eup %1249  ;;  %v704_v12 = vadd.f32 1.0, %v1248_v56  ;;  %v630_v6 = vadd.f32 %v602_v31, %v1569_v28  ;;  %v656_v15 = vmul.f32 0.7978846, %v628_v44  ;;  %v606_v17 = vmul.f32 %v578_v54, %v1605_v14 }
 0x138   : > { %953 = vmatprep.mubr.bf16.mxu1 %v755_v33  ;;  %v706_v19 = vadd.f32 1.0, %v1250_v10  ;;  %1259 = vtanh.f32 %v657_v9  ;;  %v633_v35 = vadd.f32 %v605_v57, %v1598_v8  ;;  %v635_v7 = vadd.f32 %v607_v39, %v1609_v20 }
 0x139   : > { %1261 = vtanh.f32 %v659_v62  ;;  %v658_v0 = vmul.f32 0.7978846, %v630_v6  ;;  %v732_v18 = vmul.f32 %v704_v12, %v508_v23  ;;  %v632_v22 = vadd.f32 %v604_v53, %v1593_v1 }
 0x13a   : > { %v734_v37 = vmul.f32 %v706_v19, %v510_v5  ;;  %1263 = vtanh.f32 %v656_v15  ;;  %v661_v16 = vmul.f32 0.7978846, %v633_v35  ;;  %v663_v21 = vmul.f32 0.7978846, %v635_v7 }
 0x13b   : > { %1265 = vtanh.f32 %v658_v0  ;;  %v634_v27 = vadd.f32 %v606_v17, %v1605_v14  ;;  %v660_v42 = vmul.f32 0.7978846, %v632_v22  ;;  %v513_v31 = vmul.f32 0.5, %v1537_v52 }
 0x13c   : > { %v1252_v45 = vpop.eup %1251  ;;  %v754_v26 = vpack.c.bf16 %v734_v37, %v732_v18  ;;  %1267 = vtanh.f32 %v661_v16  ;;  %v515_v23 = vmul.f32 0.5, %v1547_v50  ;;  %v512_v47 = vmul.f32 0.5, %v1530_v40  ;;  %v1659_v16 = vld [vmem:[%s1701_s4] ss:$0 sm:$0xff] }
 0x13d   : > { %v1254_v46 = vpop.eup %1253  ;;  %v709_v29 = vadd.f32 1.0, %v1252_v45  ;;  %1269 = vtanh.f32 %v663_v21  ;;  %v662_v34 = vmul.f32 0.7978846, %v634_v27  ;;  %v514_v3 = vmul.f32 0.5, %v1542_v59 }
 0x13e   : > { %954 = vmatmul.mubr.bf16.gmra.mrb[12].mxu1 %v754_v26  ;;  %v711_v32 = vadd.f32 1.0, %v1254_v46  ;;  %1271 = vtanh.f32 %v660_v42  ;;  %v517_v57 = vmul.f32 0.5, %v1566_v25  ;;  %v519_v58 = vmul.f32 0.5, %v1581_v41 }
 0x13f   : > { %v1256_v11 = vpop.eup %1255  ;;  %v737_v13 = vmul.f32 %v709_v29, %v513_v31  ;;  %1273 = vtanh.f32 %v662_v34  ;;  %v516_v40 = vmul.f32 0.5, %v1563_v24  ;;  %v518_v5 = vmul.f32 0.5, %v1569_v28 }
 0x140   : > { %v1258_v36 = vpop.eup %1257  ;;  %v739_v38 = vmul.f32 %v711_v32, %v515_v23  ;;  %v708_v43 = vadd.f32 1.0, %v1256_v11  ;;  %v521_v33 = vmul.f32 0.5, %v1598_v8  ;;  %v523_v25 = vmul.f32 0.5, %v1609_v20 }
 0x141   : > { %v710_v30 = vadd.f32 1.0, %v1258_v36  ;;  %v520_v19 = vmul.f32 0.5, %v1593_v1  ;;  %v522_v35 = vmul.f32 0.5, %v1605_v14 }
 0x142   : > { %v1260_v49 = vpop.eup %1259  ;;  %v757_v51 = vpack.c.bf16 %v739_v38, %v737_v13  ;;  %v736_v52 = vmul.f32 %v708_v43, %v512_v47 }
 0x143   : > { %v1262_v54 = vpop.eup %1261  ;;  %v738_v48 = vmul.f32 %v710_v30, %v514_v3  ;;  %v713_v50 = vadd.f32 1.0, %v1260_v49 }
 0x144   : > { %v1264_v55 = vpop.eup %1263  ;;  %961 = vmatprep.mubr.bf16.mxu1 %v757_v51  ;;  %v715_v60 = vadd.f32 1.0, %v1262_v54 }
 0x145   : > { %v1266_v61 = vpop.eup %1265  ;;  %v756_v63 = vpack.c.bf16 %v738_v48, %v736_v52  ;;  %v712_v2 = vadd.f32 1.0, %v1264_v55  ;;  %v741_v4 = vmul.f32 %v713_v50, %v517_v57 }
 0x146   : > { %v1268_v59 = vpop.eup %1267  ;;  %v743_v39 = vmul.f32 %v715_v60, %v519_v58  ;;  %v714_v44 = vadd.f32 1.0, %v1266_v61 }
 0x147   : > { %v1270_v56 = vpop.eup %1269  ;;  %962 = vmatmul.mubr.bf16.gmra.mrb[16].mxu1 %v756_v63  ;;  %v717_v9 = vadd.f32 1.0, %v1268_v59  ;;  %v740_v62 = vmul.f32 %v712_v2, %v516_v40 }
 0x148   : > { %v759_v41 = vpack.c.bf16 %v743_v39, %v741_v4  ;;  %v742_v10 = vmul.f32 %v714_v44, %v518_v5  ;;  %v719_v53 = vadd.f32 1.0, %v1270_v56  ;;  %v1272_v12 = vpop.eup %1271 }
 0x149   : > { %v1274_v24 = vpop.eup %1273  ;;  %v745_v15 = vmul.f32 %v717_v9, %v521_v33  ;;  %v716_v28 = vadd.f32 1.0, %v1272_v12 }
 0x14a   : > { %969 = vmatprep.mubr.bf16.mxu1 %v759_v41  ;;  %v758_v6 = vpack.c.bf16 %v742_v10, %v740_v62  ;;  %v747_v17 = vmul.f32 %v719_v53, %v523_v25  ;;  %v718_v8 = vadd.f32 1.0, %v1274_v24 }
 0x14b   : > { %v744_v20 = vmul.f32 %v716_v28, %v520_v19 }
 0x14c   : > { %v761_v0 = vpack.c.bf16 %v747_v17, %v745_v15  ;;  %v746_v7 = vmul.f32 %v718_v8, %v522_v35 }
 0x14e   : > { %v760_v18 = vpack.c.bf16 %v746_v7, %v744_v20 }
 0x14f   : > { %970 = vmatmul.mubr.bf16.gmra.mrb[20].mxu1 %v758_v6 }
 0x150   : > { %977 = vmatprep.mubr.bf16.mxu1 %v761_v0 }
 0x157   : > { %978 = vmatmul.mubr.bf16.gmra.mrb[24].mxu1 %v760_v18 }
 0x1ee   : > { %v1121_v37 = vpop.f32.mrb[0].mxu1 }
 0x1ef   : > { %v1122_v21 = vpop.f32.mrb[1].mxu1 }
 0x1f0   : > { %v1123_v22 = vadd.f32 %v1122_v21, %v1121_v37  ;;  %v1124_v1 = vpop.f32.mrb[2].mxu1 }
 0x1f1   : > { %v1125_v14 = vpop.f32.mrb[3].mxu1 }
 0x1f2   : > { %v932_v45 = vadd.f32 %v1123_v22, %v1659_v16  ;;  %v1126_v26 = vadd.f32 %v1125_v14, %v1124_v1 }
 0x1f4   : > { %986 = vst [vmem:[%s1664_s27] sm:$0xff] %v932_v45  ;;  %v935_v27 = vadd.f32 %v1126_v26, %v1659_v16 }
 0x1f6   : > { %987 = vst [vmem:[%s1664_s27 + $0x8] sm:$0xff] %v935_v27  ;;  %v1127_v46 = vpop.f32.mrb[4].mxu1 }
 0x1f7   : > { %v1128_v29 = vpop.f32.mrb[5].mxu1 }
 0x1f8   : > { %v1129_v42 = vadd.f32 %v1128_v29, %v1127_v46  ;;  %v1130_v31 = vpop.f32.mrb[6].mxu1 }
 0x1f9   : > { %v1131_v23 = vpop.f32.mrb[7].mxu1 }
 0x1fa   : > { %v940_v32 = vadd.f32 %v1129_v42, %v1659_v16  ;;  %v1132_v34 = vadd.f32 %v1131_v23, %v1130_v31 }
 0x1fc   : > { %988 = vst [vmem:[%s1664_s27 + $0x10] sm:$0xff] %v940_v32  ;;  %v943_v11 = vadd.f32 %v1132_v34, %v1659_v16 }
 0x1fe   : > { %989 = vst [vmem:[%s1664_s27 + $0x18] sm:$0xff] %v943_v11 }
 0x205   : > { %v1133_v36 = vpop.f32.mrb[8].mxu1 }
 0x206   : > { %v1134_v13 = vpop.f32.mrb[9].mxu1 }
 0x207   : > { %v1135_v38 = vadd.f32 %v1134_v13, %v1133_v36  ;;  %v1136_v43 = vpop.f32.mrb[10].mxu1 }
 0x208   : > { %v1137_v47 = vpop.f32.mrb[11].mxu1 }
 0x209   : > { %v948_v3 = vadd.f32 %v1135_v38, %v1659_v16  ;;  %v1138_v30 = vadd.f32 %v1137_v47, %v1136_v43 }
 0x20b   : > { %990 = vst [vmem:[%s1664_s27 + $0x20] sm:$0xff] %v948_v3  ;;  %v951_v49 = vadd.f32 %v1138_v30, %v1659_v16 }
 0x20d   : > { %991 = vst [vmem:[%s1664_s27 + $0x28] sm:$0xff] %v951_v49 }
 0x211   : > { %v1139_v51 = vpop.f32.mrb[12].mxu1 }
 0x212   : > { %v1140_v54 = vpop.f32.mrb[13].mxu1 }
 0x213   : > { %v1141_v52 = vadd.f32 %v1140_v54, %v1139_v51  ;;  %v1142_v48 = vpop.f32.mrb[14].mxu1 }
 0x214   : > { %v1143_v50 = vpop.f32.mrb[15].mxu1 }
 0x215   : > { %v956_v55 = vadd.f32 %v1141_v52, %v1659_v16  ;;  %v1144_v57 = vadd.f32 %v1143_v50, %v1142_v48 }
 0x217   : > { %992 = vst [vmem:[%s1664_s27 + $0x30] sm:$0xff] %v956_v55  ;;  %v959_v58 = vadd.f32 %v1144_v57, %v1659_v16 }
 0x219   : > { %993 = vst [vmem:[%s1664_s27 + $0x38] sm:$0xff] %v959_v58 }
 0x21a   : > { %v1145_v60 = vpop.f32.mrb[16].mxu1 }
 0x21b   : > { %v1146_v61 = vpop.f32.mrb[17].mxu1 }
 0x21c   : > { %v1147_v63 = vadd.f32 %v1146_v61, %v1145_v60  ;;  %v1148_v40 = vpop.f32.mrb[18].mxu1 }
 0x21d   : > { %v1149_v2 = vpop.f32.mrb[19].mxu1 }
 0x21e   : > { %v964_v59 = vadd.f32 %v1147_v63, %v1659_v16  ;;  %v1150_v4 = vadd.f32 %v1149_v2, %v1148_v40 }
 0x220   : > { %994 = vst [vmem:[%s1664_s27 + $0x40] sm:$0xff] %v964_v59  ;;  %v967_v39 = vadd.f32 %v1150_v4, %v1659_v16 }
 0x222   : > { %995 = vst [vmem:[%s1664_s27 + $0x48] sm:$0xff] %v967_v39  ;;  %v1151_v5 = vpop.f32.mrb[20].mxu1 }
 0x223   : > { %v1152_v44 = vpop.f32.mrb[21].mxu1 }
 0x224   : > { %v1153_v56 = vadd.f32 %v1152_v44, %v1151_v5  ;;  %v1154_v33 = vpop.f32.mrb[22].mxu1 }
 0x225   : > { %v1155_v25 = vpop.f32.mrb[23].mxu1 }
 0x226   : > { %v972_v9 = vadd.f32 %v1153_v56, %v1659_v16  ;;  %v1156_v41 = vadd.f32 %v1155_v25, %v1154_v33 }
 0x228   : > { %996 = vst [vmem:[%s1664_s27 + $0x50] sm:$0xff] %v972_v9  ;;  %v975_v62 = vadd.f32 %v1156_v41, %v1659_v16 }
 0x22a   : > { %997 = vst [vmem:[%s1664_s27 + $0x58] sm:$0xff] %v975_v62  ;;  %v1157_v10 = vpop.f32.mrb[24].mxu1 }
 0x22b   : > { %v1158_v53 = vpop.f32.mrb[25].mxu1 }
 0x22c   : > { %v1159_v12 = vadd.f32 %v1158_v53, %v1157_v10  ;;  %v1160_v24 = vpop.f32.mrb[26].mxu1 }
 0x22d   : > { %v1161_v6 = vpop.f32.mrb[27].mxu1 }
 0x22e   : > { %v980_v15 = vadd.f32 %v1159_v12, %v1659_v16  ;;  %v1162_v17 = vadd.f32 %v1161_v6, %v1160_v24 }
 0x230   : > { %998 = vst [vmem:[%s1664_s27 + $0x60] sm:$0xff] %v980_v15  ;;  %v983_v28 = vadd.f32 %v1162_v17, %v1659_v16 }
 0x232   : > { %999 = vst [vmem:[%s1664_s27 + $0x68] sm:$0xff] %v983_v28 }
 0x233 PF: > { %s15_s18 = sadd.s32 1, %s1281_s18  }
 0x234   : > { %p12_p4 = scmp.ge.s32.totalorder %s15_s18, 4  }
 0x236   :  { %14 = sbr.rel (!%p12_p4) target bundleno = 1 (0x1), region = 70 }

// kernel: siglip_mlp.1
= control target key start
LH: loop header
LB: loop body
LE: loop exit
PB: predicated region body
PF: predicated region fallthrough
CT: control target
= control target key end

     0   :  { %s1314_s18 = smov 0   ;;  %s1697_s0 = inlined_call_operand.vmem [shape: bf16[224,128], index: 0, kind: input, shape index: {}]   ;;  %s1698_s1 = inlined_call_operand.vmem [shape: bf16[128,256], index: 1, kind: input, shape index: {}]   ;;  %s1699_s2 = inlined_call_operand.vmem [shape: f32[1,256], index: 2, kind: input, shape index: {}]   ;;  %s1700_s3 = inlined_call_operand.vmem [shape: bf16[256,128], index: 3, kind: input, shape index: {}]   ;;  %s1701_s4 = inlined_call_operand.vmem [shape: f32[1,128], index: 4, kind: input, shape index: {}]   ;;  %s1702_s5 = inlined_call_operand.vmem [shape: f32[224,128], index: 5, kind: output, shape index: {}]  }
   0x1 LB: > { %s1056_s19 = sadd.s32 4294967295, %s1281_s18   ;;  %p1060_p0 = scmp.ge.s32.totalorder %s1281_s18, 1  ;;  %s1281_s18 = sphi %s1314_s18, %s15_s18  }
   0x2   : > { %p188_p1 = scmp.lt.s32.totalorder %s1281_s18, 3 }
   0x4   : > { %p189_p2 = pnand %p1060_p0, %p188_p1 }
   0x5   : > { %v1172_v0 = vld [vmem:[%s1698_s1 + $0x4] ss:$8 sps:$4 sm:$0xff] (!%p189_p2)   ;;  %s216_s22 = smul.u32 (!%p189_p2), 14, %s1056_s19  ;;  %v1174_v1 = vld [vmem:[%s1698_s1] ss:$8 sps:$4 sm:$0xff] (!%p189_p2)   ;;  %v1283_v2 = vmov (!%p189_p2), 0   ;;  %v261_v40 = vlaneseq (!%p189_p2) }
   0x6   : > { %192 = sbr.rel (%p189_p2) target bundleno = 563 (0x233), region = 40  ;;  %425 = vmatprep.mubr.bf16.mxu0 (!%p189_p2), %v1283_v2  ;;  %393 = vmatprep.subr.bf16.mxu0 (!%p189_p2), %v1172_v0  ;;  %v1175_v3 = vld [vmem:[%s1698_s1 + $0x14] ss:$8 sps:$4 sm:$0xff] (!%p189_p2)   ;;  %v1177_v4 = vld [vmem:[%s1698_s1 + $0x10] ss:$8 sps:$4 sm:$0xff] (!%p189_p2)   ;;  %v1203_v24 = vld [vmem:[%s1700_s3 + $0x40] sm:$0xff] (!%p189_p2)  }
   0x7   : > { %p217_p3 = scmp.lt.s32.totalorder (!%p189_p2), %s216_s22, 27  ;;  %394 = vmatpush1.bf16.msra.mxu0 (!%p189_p2), %v1174_v1  ;;  %v1178_v5 = vld [vmem:[%s1698_s1 + $0x24] ss:$8 sps:$4 sm:$0xff] (!%p189_p2)   ;;  %v1180_v6 = vld [vmem:[%s1698_s1 + $0x20] ss:$8 sps:$4 sm:$0xff] (!%p189_p2)   ;;  %1105 = vmatprep.subr.bf16.mxu1 (!%p189_p2), %v1203_v24  ;;  %v1207_v28 = vld [vmem:[%s1700_s3 + $0x50] sm:$0xff] (!%p189_p2)  }
   0x8   : > { %395 = vmatprep.subr.bf16.mxu0 (!%p189_p2), %v1175_v3  ;;  %v1181_v7 = vld [vmem:[%s1698_s1 + $0x34] ss:$8 sps:$4 sm:$0xff] (!%p189_p2)   ;;  %v1183_v8 = vld [vmem:[%s1698_s1 + $0x30] ss:$8 sps:$4 sm:$0xff] (!%p189_p2)   ;;  %v1184_v9 = vld [vmem:[%s1698_s1 + $0x44] ss:$8 sps:$4 sm:$0xff] (!%p189_p2)  }
   0x9   : > { %v1186_v10 = vld [vmem:[%s1698_s1 + $0x40] ss:$8 sps:$4 sm:$0xff] (!%p189_p2)   ;;  %v1187_v11 = vld [vmem:[%s1698_s1 + $0x54] ss:$8 sps:$4 sm:$0xff] (!%p189_p2)   ;;  %v1189_v12 = vld [vmem:[%s1698_s1 + $0x50] ss:$8 sps:$4 sm:$0xff] (!%p189_p2)  }
   0xa   : > { %v1190_v13 = vld [vmem:[%s1698_s1 + $0x64] ss:$8 sps:$4 sm:$0xff] (!%p189_p2)   ;;  %v1192_v14 = vld [vmem:[%s1698_s1 + $0x60] ss:$8 sps:$4 sm:$0xff] (!%p189_p2)   ;;  %v1193_v15 = vld [vmem:[%s1698_s1 + $0x74] ss:$8 sps:$4 sm:$0xff] (!%p189_p2)  }
   0xb   : > { %396 = vmatpush1.bf16.msra.mxu0 (!%p189_p2), %v1177_v4  ;;  %v1195_v16 = vld [vmem:[%s1698_s1 + $0x70] ss:$8 sps:$4 sm:$0xff] (!%p189_p2)   ;;  %v1204_v25 = vld [vmem:[%s1700_s3] sm:$0xff] (!%p189_p2)   ;;  %v1205_v26 = vld [vmem:[%s1700_s3 + $0x48] sm:$0xff] (!%p189_p2)   ;;  %v262_v41 = vshrl.u32 (!%p189_p2), %v261_v40, 7 }
   0xc   : > { %397 = vmatprep.subr.bf16.mxu0 (!%p189_p2), %v1178_v5  ;;  %1106 = vmatpush3.bf16.msra.mxu1 (!%p189_p2), %v1204_v25  ;;  %v1206_v27 = vld [vmem:[%s1700_s3 + $0x8] sm:$0xff] (!%p189_p2)   ;;  %v1208_v29 = vld [vmem:[%s1700_s3 + $0x10] sm:$0xff] (!%p189_p2)   ;;  %v1209_v30 = vld [vmem:[%s1700_s3 + $0x58] sm:$0xff] (!%p189_p2)  }
   0xd   : > { %s1704_s22 = smov (!%p217_p3, %s216_s22), 27  ;;  %1107 = vmatprep.subr.bf16.mxu1 %v1205_v26  ;;  %v1210_v31 = vld [vmem:[%s1700_s3 + $0x18] sm:$0xff]   ;;  %v1211_v32 = vld [vmem:[%s1700_s3 + $0x60] sm:$0xff]   ;;  %v1213_v34 = vld [vmem:[%s1700_s3 + $0x68] sm:$0xff]   ;;  %v263_v42 = vsub.s32 0, %v262_v41  ;;  %v267_v44 = vsub.s32 1, %v262_v41 }
   0xe   : > { %s1061_s6 = sshll.u32 %s1704_s22, 2  ;;  %v1212_v33 = vld [vmem:[%s1700_s3 + $0x20] sm:$0xff]   ;;  %v1214_v35 = vld [vmem:[%s1700_s3 + $0x28] sm:$0xff]   ;;  %v1215_v36 = vld [vmem:[%s1700_s3 + $0x70] sm:$0xff]   ;;  %s1062_s21 = sshll.u32 %s1704_s22, 3 }
   0xf   : > { %s1349_s13 = scalar_lea.vmem %s1697_s0, %s1061_s6  ;;  %398 = vmatpush1.bf16.msra.mxu0 %v1180_v6  ;;  %v1216_v37 = vld [vmem:[%s1700_s3 + $0x30] sm:$0xff]   ;;  %v1217_v38 = vld [vmem:[%s1700_s3 + $0x78] sm:$0xff]   ;;  %v259_v43 = vld [vmem:[%s1699_s2] sm:$0x3]  ;;  %s1664_s27 = scalar_lea.vmem %s1702_s5, %s1062_s21 }
  0x10   : > { %399 = vmatprep.subr.bf16.mxu0 %v1181_v7  ;;  %v1196_v17 = vld [vmem:[%s1349_s13] sm:$0xff]   ;;  %v1197_v18 = vld [vmem:[%s1349_s13 + $0x8] sm:$0xff]   ;;  %v1198_v19 = vld [vmem:[%s1349_s13 + $0x10] sm:$0xff]   ;;  %1108 = vmatpush3.bf16.msra.mxu1 %v1206_v27  ;;  %v1436_v45 = vrot.slane %v259_v43, %v263_v42  ;;  %v1438_v46 = vrot.slane %v259_v43, %v267_v44 }
  0x11   : > { %v1199_v20 = vld [vmem:[%s1349_s13 + $0x18] sm:$0xff]   ;;  %v1200_v21 = vld [vmem:[%s1349_s13 + $0x20] sm:$0xff]   ;;  %v1201_v22 = vld [vmem:[%s1349_s13 + $0x28] sm:$0xff]   ;;  %1109 = vmatprep.subr.bf16.mxu1 %v1207_v28 }
  0x12   : > { %v1202_v23 = vld [vmem:[%s1349_s13 + $0x30] sm:$0xff]   ;;  %v1218_v39 = vld [vmem:[%s1700_s3 + $0x38] sm:$0xff]  }
  0x13   : > { %400 = vmatpush1.bf16.msra.mxu0 %v1183_v8 }
  0x14   : > { %401 = vmatprep.subr.bf16.mxu0 %v1184_v9  ;;  %1110 = vmatpush3.bf16.msra.mxu1 %v1208_v29 }
  0x15   : > { %1111 = vmatprep.subr.bf16.mxu1 %v1209_v30 }
  0x17   : > { %402 = vmatpush1.bf16.msra.mxu0 %v1186_v10 }
  0x18   : > { %403 = vmatprep.subr.bf16.mxu0 %v1187_v11  ;;  %1112 = vmatpush3.bf16.msra.mxu1 %v1210_v31 }
  0x19   : > { %1113 = vmatprep.subr.bf16.mxu1 %v1211_v32 }
  0x1b   : > { %404 = vmatpush1.bf16.msra.mxu0 %v1189_v12 }
  0x1c   : > { %405 = vmatprep.subr.bf16.mxu0 %v1190_v13  ;;  %1114 = vmatpush3.bf16.msra.mxu1 %v1212_v33 }
  0x1d   : > { %1115 = vmatprep.subr.bf16.mxu1 %v1213_v34 }
  0x1f   : > { %406 = vmatpush1.bf16.msra.mxu0 %v1192_v14 }
  0x20   : > { %407 = vmatprep.subr.bf16.mxu0 %v1193_v15  ;;  %1116 = vmatpush3.bf16.msra.mxu1 %v1214_v35 }
  0x21   : > { %1117 = vmatprep.subr.bf16.mxu1 %v1215_v36 }
  0x23   : > { %408 = vmatpush1.bf16.msra.mxu0 %v1195_v16 }
  0x24   : > { %1118 = vmatpush3.bf16.msra.mxu1 %v1216_v37 }
  0x25   : > { %1119 = vmatprep.subr.bf16.mxu1 %v1217_v38 }
  0x26   : > { %426 = vmatmul.mubr.bf16.vlgmr.msra.gmra.mrb[0].mxu0 %v1196_v17 }
  0x27   : > { %435 = vmatprep.mubr.bf16.mxu0 %v1283_v2 }
  0x28   : > { %1120 = vmatpush3.bf16.msra.mxu1 %v1218_v39 }
  0x2e   : > { %436 = vmatmul.mubr.bf16.gmra.mrb[4].mxu0 %v1197_v18 }
  0x2f   : > { %445 = vmatprep.mubr.bf16.mxu0 %v1283_v2 }
  0x36   : > { %446 = vmatmul.mubr.bf16.gmra.mrb[8].mxu0 %v1198_v19 }
  0x37   : > { %455 = vmatprep.mubr.bf16.mxu0 %v1283_v2 }
  0x3e   : > { %456 = vmatmul.mubr.bf16.gmra.mrb[12].mxu0 %v1199_v20 }
  0x3f   : > { %465 = vmatprep.mubr.bf16.mxu0 %v1283_v2 }
  0x46   : > { %466 = vmatmul.mubr.bf16.gmra.mrb[16].mxu0 %v1200_v21 }
  0x47   : > { %475 = vmatprep.mubr.bf16.mxu0 %v1283_v2 }
  0x4e   : > { %476 = vmatmul.mubr.bf16.gmra.mrb[20].mxu0 %v1201_v22 }
  0x4f   : > { %485 = vmatprep.mubr.bf16.mxu0 %v1283_v2 }
  0x56   : > { %486 = vmatmul.mubr.bf16.gmra.mrb[24].mxu0 %v1202_v23 }
  0xf9   : > { %v427_v47 = vpop.f32.mrb[0].mxu0 }
  0xfa   : > { %v428_v48 = vadd.f32 %v427_v47, %v1436_v45  ;;  %v429_v49 = vpop.f32.mrb[1].mxu0 }
  0xfb   : > { %v1442_v50 = vadd.f32 %v429_v49, %v1438_v46  ;;  %v431_v51 = vpop.f32.mrb[2].mxu0 }
  0xfc   : > { %v524_v52 = vmul.f32 0.044715, %v428_v48  ;;  %v1445_v53 = vadd.f32 %v431_v51, %v1436_v45  ;;  %v433_v54 = vpop.f32.mrb[3].mxu0  ;;  %v496_v39 = vmul.f32 0.5, %v428_v48 }
  0xfd   : > { %v525_v55 = vmul.f32 0.044715, %v1442_v50  ;;  %v1449_v56 = vadd.f32 %v433_v54, %v1438_v46  ;;  %v497_v49 = vmul.f32 0.5, %v1442_v50 }
  0xfe   : > { %v552_v57 = vmul.f32 %v524_v52, %v428_v48  ;;  %v526_v58 = vmul.f32 0.044715, %v1445_v53 }
  0xff   : > { %v527_v59 = vmul.f32 0.044715, %v1449_v56  ;;  %v553_v60 = vmul.f32 %v525_v55, %v1442_v50 }
 0x100   : > { %v580_v61 = vmul.f32 %v552_v57, %v428_v48  ;;  %v554_v62 = vmul.f32 %v526_v58, %v1445_v53 }
 0x101   : > { %v437_v63 = vpop.f32.mrb[4].mxu0  ;;  %v555_v0 = vmul.f32 %v527_v59, %v1449_v56  ;;  %v581_v1 = vmul.f32 %v553_v60, %v1442_v50  ;;  %v499_v59 = vmul.f32 0.5, %v1449_v56  ;;  %v498_v60 = vmul.f32 0.5, %v1445_v53 }
 0x102   : > { %v582_v2 = vmul.f32 %v554_v62, %v1445_v53  ;;  %v1459_v3 = vadd.f32 %v437_v63, %v1436_v45  ;;  %v439_v4 = vpop.f32.mrb[5].mxu0  ;;  %v608_v5 = vadd.f32 %v580_v61, %v428_v48 }
 0x103   : > { %v440_v6 = vadd.f32 %v439_v4, %v1438_v46  ;;  %v441_v7 = vpop.f32.mrb[6].mxu0  ;;  %v583_v8 = vmul.f32 %v555_v0, %v1449_v56  ;;  %v609_v9 = vadd.f32 %v581_v1, %v1442_v50 }
 0x104   : > { %v528_v10 = vmul.f32 0.044715, %v1459_v3  ;;  %v1466_v11 = vadd.f32 %v441_v7, %v1436_v45  ;;  %v443_v12 = vpop.f32.mrb[7].mxu0  ;;  %v610_v13 = vadd.f32 %v582_v2, %v1445_v53  ;;  %v636_v14 = vmul.f32 0.7978846, %v608_v5 }
 0x105   : > { %v529_v15 = vmul.f32 0.044715, %v440_v6  ;;  %v444_v16 = vadd.f32 %v443_v12, %v1438_v46  ;;  %v611_v17 = vadd.f32 %v583_v8, %v1449_v56  ;;  %v637_v18 = vmul.f32 0.7978846, %v609_v9 }
 0x106   : > { %v556_v19 = vmul.f32 %v528_v10, %v1459_v3  ;;  %v530_v20 = vmul.f32 0.044715, %v1466_v11  ;;  %v638_v21 = vmul.f32 0.7978846, %v610_v13  ;;  %1219 = vtanh.f32 %v636_v14 }
 0x107   : > { %v557_v22 = vmul.f32 %v529_v15, %v440_v6  ;;  %v531_v23 = vmul.f32 0.044715, %v444_v16  ;;  %v639_v24 = vmul.f32 0.7978846, %v611_v17  ;;  %1221 = vtanh.f32 %v637_v18 }
 0x108   : > { %v584_v25 = vmul.f32 %v556_v19, %v1459_v3  ;;  %v558_v26 = vmul.f32 %v530_v20, %v1466_v11  ;;  %1223 = vtanh.f32 %v638_v21  ;;  %v1498_v0 = vmul.f32 0.5, %v440_v6 }
 0x109   : > { %v585_v27 = vmul.f32 %v557_v22, %v440_v6  ;;  %v559_v28 = vmul.f32 %v531_v23, %v444_v16  ;;  %v447_v29 = vpop.f32.mrb[8].mxu0  ;;  %1225 = vtanh.f32 %v639_v24  ;;  %v503_v7 = vmul.f32 0.5, %v444_v16 }
 0x10a   : > { %v586_v30 = vmul.f32 %v558_v26, %v1466_v11  ;;  %v449_v31 = vpop.f32.mrb[9].mxu0  ;;  %v612_v36 = vadd.f32 %v584_v25, %v1459_v3  ;;  %v1481_v37 = vadd.f32 %v447_v29, %v1436_v45  ;;  %v502_v23 = vmul.f32 0.5, %v1466_v11 }
 0x10b   : > { %v587_v32 = vmul.f32 %v559_v28, %v444_v16  ;;  %v1477_v33 = vadd.f32 %v449_v31, %v1438_v46  ;;  %v451_v34 = vpop.f32.mrb[10].mxu0  ;;  %v613_v35 = vadd.f32 %v585_v27, %v440_v6 }
 0x10c   : > { %v453_v38 = vpop.f32.mrb[11].mxu0  ;;  %v614_v40 = vadd.f32 %v586_v30, %v1466_v11  ;;  %v1489_v47 = vadd.f32 %v451_v34, %v1436_v45  ;;  %v640_v51 = vmul.f32 0.7978846, %v612_v36  ;;  %v532_v58 = vmul.f32 0.044715, %v1481_v37 }
 0x10d   : > { %v533_v41 = vmul.f32 0.044715, %v1477_v33  ;;  %v1486_v42 = vadd.f32 %v453_v38, %v1438_v46  ;;  %v615_v43 = vadd.f32 %v587_v32, %v444_v16  ;;  %v641_v44 = vmul.f32 0.7978846, %v613_v35 }
 0x10e   : > { %v642_v52 = vmul.f32 0.7978846, %v614_v40  ;;  %v534_v56 = vmul.f32 0.044715, %v1489_v47  ;;  %v560_v6 = vmul.f32 %v532_v58, %v1481_v37  ;;  %v500_v16 = vmul.f32 0.5, %v1459_v3 }
 0x10f   : > { %v561_v54 = vmul.f32 %v533_v41, %v1477_v33  ;;  %v535_v48 = vmul.f32 0.044715, %v1486_v42  ;;  %v643_v55 = vmul.f32 0.7978846, %v615_v43  ;;  %1227 = vtanh.f32 %v641_v44 }
 0x110   : > { %v1220_v57 = vpop.eup %1219  ;;  %1229 = vtanh.f32 %v640_v51  ;;  %v562_v25 = vmul.f32 %v534_v56, %v1489_v47  ;;  %v1520_v3 = vmul.f32 0.5, %v1481_v37  ;;  %v588_v34 = vmul.f32 %v560_v6, %v1481_v37 }
 0x111   : > { %v1222_v61 = vpop.eup %1221  ;;  %v563_v62 = vmul.f32 %v535_v48, %v1486_v42  ;;  %v457_v50 = vpop.f32.mrb[12].mxu0  ;;  %v692_v63 = vadd.f32 1.0, %v1220_v57  ;;  %1231 = vtanh.f32 %v643_v55  ;;  %v589_v2 = vmul.f32 %v561_v54, %v1477_v33 }
 0x112   : > { %v1224_v1 = vpop.eup %1223  ;;  %v459_v4 = vpop.f32.mrb[13].mxu0  ;;  %v693_v5 = vadd.f32 1.0, %v1222_v61  ;;  %1233 = vtanh.f32 %v642_v52  ;;  %v1508_v13 = vadd.f32 %v457_v50, %v1436_v45  ;;  %v1533_v44 = vmul.f32 0.5, %v1477_v33 }
 0x113   : > { %v1226_v8 = vpop.eup %1225  ;;  %v591_v53 = vmul.f32 %v563_v62, %v1486_v42  ;;  %v1504_v9 = vadd.f32 %v459_v4, %v1438_v46  ;;  %v461_v10 = vpop.f32.mrb[14].mxu0  ;;  %v694_v12 = vadd.f32 1.0, %v1224_v1  ;;  %v720_v19 = vmul.f32 %v692_v63, %v496_v39 }
 0x114   : > { %v463_v14 = vpop.f32.mrb[15].mxu0  ;;  %v695_v15 = vadd.f32 1.0, %v1226_v8  ;;  %v721_v21 = vmul.f32 %v693_v5, %v497_v49  ;;  %v617_v24 = vadd.f32 %v589_v2, %v1477_v33  ;;  %v536_v28 = vmul.f32 0.044715, %v1508_v13 }
 0x115   : > { %v537_v17 = vmul.f32 0.044715, %v1504_v9  ;;  %v1513_v18 = vadd.f32 %v463_v14, %v1438_v46  ;;  %v722_v20 = vmul.f32 %v694_v12, %v498_v60  ;;  %v619_v27 = vadd.f32 %v591_v53, %v1486_v42 }
 0x116   : > { %v723_v22 = vmul.f32 %v695_v15, %v499_v59  ;;  %v645_v31 = vmul.f32 0.7978846, %v617_v24  ;;  %v1527_v35 = vadd.f32 %v461_v10, %v1436_v45  ;;  %v590_v51 = vmul.f32 %v562_v25, %v1489_v47 }
 0x117   : > { %v748_v26 = vpack.c.bf16 %v722_v20, %v720_v19  ;;  %v539_v29 = vmul.f32 0.044715, %v1513_v18  ;;  %v565_v11 = vmul.f32 %v537_v17, %v1504_v9  ;;  %v647_v38 = vmul.f32 0.7978846, %v619_v27 }
 0x118   : > { %v749_v30 = vpack.c.bf16 %v723_v22, %v721_v21  ;;  %1235 = vtanh.f32 %v645_v31  ;;  %v564_v57 = vmul.f32 %v536_v28, %v1508_v13  ;;  %v538_v62 = vmul.f32 0.044715, %v1527_v35 }
 0x119   : > { %v1228_v32 = vpop.eup %1227  ;;  %v467_v36 = vpop.f32.mrb[16].mxu0  ;;  %1237 = vtanh.f32 %v647_v38  ;;  %v567_v58 = vmul.f32 %v539_v29, %v1513_v18  ;;  %v593_v61 = vmul.f32 %v565_v11, %v1504_v9  ;;  %v616_v5 = vadd.f32 %v588_v34, %v1481_v37 }
 0x11a   : > { %v1230_v39 = vpop.eup %1229  ;;  %v1530_v40 = vadd.f32 %v467_v36, %v1436_v45  ;;  %v469_v41 = vpop.f32.mrb[17].mxu0  ;;  %929 = vmatprep.mubr.bf16.mxu1 %v749_v30  ;;  %v697_v43 = vadd.f32 1.0, %v1228_v32  ;;  %v618_v10 = vadd.f32 %v590_v51, %v1489_v47  ;;  %v566_v17 = vmul.f32 %v538_v62, %v1527_v35 }
 0x11b   : > { %v1232_v49 = vpop.eup %1231  ;;  %v1537_v52 = vadd.f32 %v469_v41, %v1438_v46  ;;  %v471_v54 = vpop.f32.mrb[18].mxu0  ;;  %930 = vmatmul.mubr.bf16.vlgmr.msra.gmra.mrb[0].mxu1 %v748_v26  ;;  %v696_v48 = vadd.f32 1.0, %v1230_v39  ;;  %v595_v12 = vmul.f32 %v567_v58, %v1513_v18  ;;  %v644_v15 = vmul.f32 0.7978846, %v616_v5 }
 0x11c   : > { %v1234_v55 = vpop.eup %1233  ;;  %v1542_v59 = vadd.f32 %v471_v54, %v1436_v45  ;;  %v473_v33 = vpop.f32.mrb[19].mxu0  ;;  %v699_v60 = vadd.f32 1.0, %v1232_v49  ;;  %v540_v1 = vmul.f32 0.044715, %v1530_v40  ;;  %v725_v2 = vmul.f32 %v697_v43, %v1498_v0 }
 0x11d   : > { %v1547_v50 = vadd.f32 %v473_v33, %v1438_v46  ;;  %v698_v63 = vadd.f32 1.0, %v1234_v55  ;;  %v541_v8 = vmul.f32 0.044715, %v1537_v52  ;;  %v724_v56 = vmul.f32 %v696_v48, %v500_v16 }
 0x11e   : > { %v727_v4 = vmul.f32 %v699_v60, %v503_v7  ;;  %v542_v6 = vmul.f32 0.044715, %v1542_v59  ;;  %v646_v20 = vmul.f32 0.7978846, %v618_v10  ;;  %v592_v37 = vmul.f32 %v564_v57, %v1508_v13 }
 0x11f   : > { %v726_v53 = vmul.f32 %v698_v63, %v502_v23  ;;  %v543_v19 = vmul.f32 0.044715, %v1547_v50  ;;  %v568_v16 = vmul.f32 %v540_v1, %v1530_v40  ;;  %v507_v22 = vmul.f32 0.5, %v1486_v42 }
 0x120   : > { %v751_v14 = vpack.c.bf16 %v727_v4, %v725_v2  ;;  %1239 = vtanh.f32 %v644_v15  ;;  %v569_v23 = vmul.f32 %v541_v8, %v1537_v52  ;;  %v506_v30 = vmul.f32 0.5, %v1489_v47 }
 0x121   : > { %v477_v0 = vpop.f32.mrb[20].mxu0  ;;  %v750_v7 = vpack.c.bf16 %v726_v53, %v724_v56  ;;  %1241 = vtanh.f32 %v646_v20  ;;  %v621_v42 = vadd.f32 %v593_v61, %v1504_v9  ;;  %v623_v31 = vadd.f32 %v595_v12, %v1513_v18 }
 0x122   : > { %v479_v21 = vpop.f32.mrb[21].mxu0  ;;  %937 = vmatprep.mubr.bf16.mxu1 %v751_v14  ;;  %v1563_v24 = vadd.f32 %v477_v0, %v1436_v45  ;;  %v1236_v27 = vpop.eup %1235  ;;  %v594_v34 = vmul.f32 %v566_v17, %v1527_v35  ;;  %v570_v11 = vmul.f32 %v542_v6, %v1542_v59  ;;  %v571_v36 = vmul.f32 %v543_v19, %v1547_v50 }
 0x123   : > { %v1566_v25 = vadd.f32 %v479_v21, %v1438_v46  ;;  %v481_v26 = vpop.f32.mrb[22].mxu0  ;;  %938 = vmatmul.mubr.bf16.gmra.mrb[4].mxu1 %v750_v7  ;;  %v1238_v32 = vpop.eup %1237  ;;  %v701_v38 = vadd.f32 1.0, %v1236_v27  ;;  %v1578_v39 = vmul.f32 %v568_v16, %v1530_v40  ;;  %v649_v47 = vmul.f32 0.7978846, %v621_v42 }
 0x124   : > { %v1569_v28 = vadd.f32 %v481_v26, %v1436_v45  ;;  %v483_v29 = vpop.f32.mrb[23].mxu0  ;;  %v703_v43 = vadd.f32 1.0, %v1238_v32  ;;  %v597_v49 = vmul.f32 %v569_v23, %v1537_v52  ;;  %v544_v51 = vmul.f32 0.044715, %v1563_v24 }
 0x125   : > { %v1581_v41 = vadd.f32 %v483_v29, %v1438_v46  ;;  %v545_v54 = vmul.f32 0.044715, %v1566_v25  ;;  %v651_v48 = vmul.f32 0.7978846, %v623_v31  ;;  %v729_v57 = vmul.f32 %v701_v38, %v1533_v44 }
 0x126   : > { %v546_v55 = vmul.f32 0.044715, %v1569_v28  ;;  %v731_v58 = vmul.f32 %v703_v43, %v507_v22  ;;  %1243 = vtanh.f32 %v649_v47  ;;  %v598_v33 = vmul.f32 %v570_v11, %v1542_v59 }
 0x127   : > { %v599_v60 = vmul.f32 %v571_v36, %v1547_v50  ;;  %v509_v62 = vmul.f32 0.5, %v1504_v9  ;;  %1245 = vtanh.f32 %v651_v48  ;;  %v547_v63 = vmul.f32 0.044715, %v1581_v41 }
 0x128   : > { %v753_v4 = vpack.c.bf16 %v731_v58, %v729_v57  ;;  %v620_v5 = vadd.f32 %v592_v37, %v1508_v13  ;;  %v572_v44 = vmul.f32 %v544_v51, %v1563_v24  ;;  %v511_v53 = vmul.f32 0.5, %v1513_v18 }
 0x129   : > { %v487_v61 = vpop.f32.mrb[24].mxu0  ;;  %v622_v9 = vadd.f32 %v594_v34, %v1527_v35  ;;  %v573_v12 = vmul.f32 %v545_v54, %v1566_v25  ;;  %v574_v6 = vmul.f32 %v546_v55, %v1569_v28  ;;  %v575_v37 = vmul.f32 %v547_v63, %v1581_v41 }
 0x12a   : > { %v1593_v1 = vadd.f32 %v487_v61, %v1436_v45  ;;  %v489_v2 = vpop.f32.mrb[25].mxu0  ;;  %v1240_v10 = vpop.eup %1239  ;;  %945 = vmatprep.mubr.bf16.mxu1 %v753_v4  ;;  %v648_v17 = vmul.f32 0.7978846, %v620_v5  ;;  %v600_v22 = vmul.f32 %v572_v44, %v1563_v24  ;;  %v508_v23 = vmul.f32 0.5, %v1508_v13 }
 0x12b   : > { %v1598_v8 = vadd.f32 %v489_v2, %v1438_v46  ;;  %v491_v56 = vpop.f32.mrb[26].mxu0  ;;  %v1242_v19 = vpop.eup %1241  ;;  %v700_v7 = vadd.f32 1.0, %v1240_v10  ;;  %v650_v18 = vmul.f32 0.7978846, %v622_v9  ;;  %v625_v29 = vadd.f32 %v597_v49, %v1537_v52 }
 0x12c   : > { %v1605_v14 = vadd.f32 %v491_v56, %v1436_v45  ;;  %v493_v15 = vpop.f32.mrb[27].mxu0  ;;  %v548_v16 = vmul.f32 0.044715, %v1593_v1  ;;  %v702_v21 = vadd.f32 1.0, %v1242_v19  ;;  %1247 = vtanh.f32 %v648_v17 }
 0x12d   : > { %v549_v0 = vmul.f32 0.044715, %v1598_v8  ;;  %v1609_v20 = vadd.f32 %v493_v15, %v1438_v46  ;;  %1249 = vtanh.f32 %v650_v18  ;;  %v728_v27 = vmul.f32 %v700_v7, %v1520_v3 }
 0x12e   : > { %v550_v26 = vmul.f32 0.044715, %v1605_v14  ;;  %v730_v46 = vmul.f32 %v702_v21, %v506_v30  ;;  %v601_v42 = vmul.f32 %v573_v12, %v1566_v25  ;;  %v602_v31 = vmul.f32 %v574_v6, %v1569_v28 }
 0x12f   : > { %v551_v45 = vmul.f32 0.044715, %v1609_v20  ;;  %v577_v32 = vmul.f32 %v549_v0, %v1598_v8  ;;  %v627_v34 = vadd.f32 %v599_v60, %v1547_v50  ;;  %v603_v36 = vmul.f32 %v575_v37, %v1581_v41 }
 0x130   : > { %v1244_v11 = vpop.eup %1243  ;;  %v576_v13 = vmul.f32 %v548_v16, %v1593_v1  ;;  %v752_v38 = vpack.c.bf16 %v730_v46, %v728_v27  ;;  %v653_v43 = vmul.f32 0.7978846, %v625_v29  ;;  %v624_v51 = vadd.f32 %v1578_v39, %v1530_v40 }
 0x131   : > { %v1246_v47 = vpop.eup %1245  ;;  %v579_v3 = vmul.f32 %v551_v45, %v1609_v20  ;;  %v705_v30 = vadd.f32 1.0, %v1244_v11  ;;  %v655_v49 = vmul.f32 0.7978846, %v627_v34  ;;  %v578_v54 = vmul.f32 %v550_v26, %v1605_v14 }
 0x132   : > { %946 = vmatmul.mubr.bf16.gmra.mrb[8].mxu1 %v752_v38  ;;  %v707_v48 = vadd.f32 1.0, %v1246_v47  ;;  %1251 = vtanh.f32 %v653_v43  ;;  %v626_v55 = vadd.f32 %v598_v33, %v1542_v59  ;;  %v605_v57 = vmul.f32 %v577_v32, %v1598_v8 }
 0x133   : > { %v733_v58 = vmul.f32 %v705_v30, %v509_v62  ;;  %1253 = vtanh.f32 %v655_v49  ;;  %v652_v60 = vmul.f32 0.7978846, %v624_v51  ;;  %v629_v2 = vadd.f32 %v601_v42, %v1566_v25 }
 0x134   : > { %v735_v61 = vmul.f32 %v707_v48, %v511_v53  ;;  %v654_v63 = vmul.f32 0.7978846, %v626_v55  ;;  %v631_v4 = vadd.f32 %v603_v36, %v1581_v41  ;;  %v607_v39 = vmul.f32 %v579_v3, %v1609_v20 }
 0x135   : > { %v510_v5 = vmul.f32 0.5, %v1527_v35  ;;  %1255 = vtanh.f32 %v652_v60  ;;  %v628_v44 = vadd.f32 %v600_v22, %v1563_v24  ;;  %v657_v9 = vmul.f32 0.7978846, %v629_v2 }
 0x136   : > { %v1248_v56 = vpop.eup %1247  ;;  %v755_v33 = vpack.c.bf16 %v735_v61, %v733_v58  ;;  %1257 = vtanh.f32 %v654_v63  ;;  %v659_v62 = vmul.f32 0.7978846, %v631_v4  ;;  %v604_v53 = vmul.f32 %v576_v13, %v1593_v1 }
 0x137   : > { %v1250_v10 = vpop.eup %1249  ;;  %v704_v12 = vadd.f32 1.0, %v1248_v56  ;;  %v630_v6 = vadd.f32 %v602_v31, %v1569_v28  ;;  %v656_v15 = vmul.f32 0.7978846, %v628_v44  ;;  %v606_v17 = vmul.f32 %v578_v54, %v1605_v14 }
 0x138   : > { %953 = vmatprep.mubr.bf16.mxu1 %v755_v33  ;;  %v706_v19 = vadd.f32 1.0, %v1250_v10  ;;  %1259 = vtanh.f32 %v657_v9  ;;  %v633_v35 = vadd.f32 %v605_v57, %v1598_v8  ;;  %v635_v7 = vadd.f32 %v607_v39, %v1609_v20 }
 0x139   : > { %1261 = vtanh.f32 %v659_v62  ;;  %v658_v0 = vmul.f32 0.7978846, %v630_v6  ;;  %v732_v18 = vmul.f32 %v704_v12, %v508_v23  ;;  %v632_v22 = vadd.f32 %v604_v53, %v1593_v1 }
 0x13a   : > { %v734_v37 = vmul.f32 %v706_v19, %v510_v5  ;;  %1263 = vtanh.f32 %v656_v15  ;;  %v661_v16 = vmul.f32 0.7978846, %v633_v35  ;;  %v663_v21 = vmul.f32 0.7978846, %v635_v7 }
 0x13b   : > { %1265 = vtanh.f32 %v658_v0  ;;  %v634_v27 = vadd.f32 %v606_v17, %v1605_v14  ;;  %v660_v42 = vmul.f32 0.7978846, %v632_v22  ;;  %v513_v31 = vmul.f32 0.5, %v1537_v52 }
 0x13c   : > { %v1252_v45 = vpop.eup %1251  ;;  %v754_v26 = vpack.c.bf16 %v734_v37, %v732_v18  ;;  %1267 = vtanh.f32 %v661_v16  ;;  %v515_v23 = vmul.f32 0.5, %v1547_v50  ;;  %v512_v47 = vmul.f32 0.5, %v1530_v40  ;;  %v1659_v16 = vld [vmem:[%s1701_s4] ss:$0 sm:$0xff] }
 0x13d   : > { %v1254_v46 = vpop.eup %1253  ;;  %v709_v29 = vadd.f32 1.0, %v1252_v45  ;;  %1269 = vtanh.f32 %v663_v21  ;;  %v662_v34 = vmul.f32 0.7978846, %v634_v27  ;;  %v514_v3 = vmul.f32 0.5, %v1542_v59 }
 0x13e   : > { %954 = vmatmul.mubr.bf16.gmra.mrb[12].mxu1 %v754_v26  ;;  %v711_v32 = vadd.f32 1.0, %v1254_v46  ;;  %1271 = vtanh.f32 %v660_v42  ;;  %v517_v57 = vmul.f32 0.5, %v1566_v25  ;;  %v519_v58 = vmul.f32 0.5, %v1581_v41 }
 0x13f   : > { %v1256_v11 = vpop.eup %1255  ;;  %v737_v13 = vmul.f32 %v709_v29, %v513_v31  ;;  %1273 = vtanh.f32 %v662_v34  ;;  %v516_v40 = vmul.f32 0.5, %v1563_v24  ;;  %v518_v5 = vmul.f32 0.5, %v1569_v28 }
 0x140   : > { %v1258_v36 = vpop.eup %1257  ;;  %v739_v38 = vmul.f32 %v711_v32, %v515_v23  ;;  %v708_v43 = vadd.f32 1.0, %v1256_v11  ;;  %v521_v33 = vmul.f32 0.5, %v1598_v8  ;;  %v523_v25 = vmul.f32 0.5, %v1609_v20 }
 0x141   : > { %v710_v30 = vadd.f32 1.0, %v1258_v36  ;;  %v520_v19 = vmul.f32 0.5, %v1593_v1  ;;  %v522_v35 = vmul.f32 0.5, %v1605_v14 }
 0x142   : > { %v1260_v49 = vpop.eup %1259  ;;  %v757_v51 = vpack.c.bf16 %v739_v38, %v737_v13  ;;  %v736_v52 = vmul.f32 %v708_v43, %v512_v47 }
 0x143   : > { %v1262_v54 = vpop.eup %1261  ;;  %v738_v48 = vmul.f32 %v710_v30, %v514_v3  ;;  %v713_v50 = vadd.f32 1.0, %v1260_v49 }
 0x144   : > { %v1264_v55 = vpop.eup %1263  ;;  %961 = vmatprep.mubr.bf16.mxu1 %v757_v51  ;;  %v715_v60 = vadd.f32 1.0, %v1262_v54 }
 0x145   : > { %v1266_v61 = vpop.eup %1265  ;;  %v756_v63 = vpack.c.bf16 %v738_v48, %v736_v52  ;;  %v712_v2 = vadd.f32 1.0, %v1264_v55  ;;  %v741_v4 = vmul.f32 %v713_v50, %v517_v57 }
 0x146   : > { %v1268_v59 = vpop.eup %1267  ;;  %v743_v39 = vmul.f32 %v715_v60, %v519_v58  ;;  %v714_v44 = vadd.f32 1.0, %v1266_v61 }
 0x147   : > { %v1270_v56 = vpop.eup %1269  ;;  %962 = vmatmul.mubr.bf16.gmra.mrb[16].mxu1 %v756_v63  ;;  %v717_v9 = vadd.f32 1.0, %v1268_v59  ;;  %v740_v62 = vmul.f32 %v712_v2, %v516_v40 }
 0x148   : > { %v759_v41 = vpack.c.bf16 %v743_v39, %v741_v4  ;;  %v742_v10 = vmul.f32 %v714_v44, %v518_v5  ;;  %v719_v53 = vadd.f32 1.0, %v1270_v56  ;;  %v1272_v12 = vpop.eup %1271 }
 0x149   : > { %v1274_v24 = vpop.eup %1273  ;;  %v745_v15 = vmul.f32 %v717_v9, %v521_v33  ;;  %v716_v28 = vadd.f32 1.0, %v1272_v12 }
 0x14a   : > { %969 = vmatprep.mubr.bf16.mxu1 %v759_v41  ;;  %v758_v6 = vpack.c.bf16 %v742_v10, %v740_v62  ;;  %v747_v17 = vmul.f32 %v719_v53, %v523_v25  ;;  %v718_v8 = vadd.f32 1.0, %v1274_v24 }
 0x14b   : > { %v744_v20 = vmul.f32 %v716_v28, %v520_v19 }
 0x14c   : > { %v761_v0 = vpack.c.bf16 %v747_v17, %v745_v15  ;;  %v746_v7 = vmul.f32 %v718_v8, %v522_v35 }
 0x14e   : > { %v760_v18 = vpack.c.bf16 %v746_v7, %v744_v20 }
 0x14f   : > { %970 = vmatmul.mubr.bf16.gmra.mrb[20].mxu1 %v758_v6 }
 0x150   : > { %977 = vmatprep.mubr.bf16.mxu1 %v761_v0 }
 0x157   : > { %978 = vmatmul.mubr.bf16.gmra.mrb[24].mxu1 %v760_v18 }
 0x1ee   : > { %v1121_v37 = vpop.f32.mrb[0].mxu1 }
 0x1ef   : > { %v1122_v21 = vpop.f32.mrb[1].mxu1 }
 0x1f0   : > { %v1123_v22 = vadd.f32 %v1122_v21, %v1121_v37  ;;  %v1124_v1 = vpop.f32.mrb[2].mxu1 }
 0x1f1   : > { %v1125_v14 = vpop.f32.mrb[3].mxu1 }
 0x1f2   : > { %v932_v45 = vadd.f32 %v1123_v22, %v1659_v16  ;;  %v1126_v26 = vadd.f32 %v1125_v14, %v1124_v1 }
 0x1f4   : > { %986 = vst [vmem:[%s1664_s27] sm:$0xff] %v932_v45  ;;  %v935_v27 = vadd.f32 %v1126_v26, %v1659_v16 }
 0x1f6   : > { %987 = vst [vmem:[%s1664_s27 + $0x8] sm:$0xff] %v935_v27  ;;  %v1127_v46 = vpop.f32.mrb[4].mxu1 }
 0x1f7   : > { %v1128_v29 = vpop.f32.mrb[5].mxu1 }
 0x1f8   : > { %v1129_v42 = vadd.f32 %v1128_v29, %v1127_v46  ;;  %v1130_v31 = vpop.f32.mrb[6].mxu1 }
 0x1f9   : > { %v1131_v23 = vpop.f32.mrb[7].mxu1 }
 0x1fa   : > { %v940_v32 = vadd.f32 %v1129_v42, %v1659_v16  ;;  %v1132_v34 = vadd.f32 %v1131_v23, %v1130_v31 }
 0x1fc   : > { %988 = vst [vmem:[%s1664_s27 + $0x10] sm:$0xff] %v940_v32  ;;  %v943_v11 = vadd.f32 %v1132_v34, %v1659_v16 }
 0x1fe   : > { %989 = vst [vmem:[%s1664_s27 + $0x18] sm:$0xff] %v943_v11 }
 0x205   : > { %v1133_v36 = vpop.f32.mrb[8].mxu1 }
 0x206   : > { %v1134_v13 = vpop.f32.mrb[9].mxu1 }
 0x207   : > { %v1135_v38 = vadd.f32 %v1134_v13, %v1133_v36  ;;  %v1136_v43 = vpop.f32.mrb[10].mxu1 }
 0x208   : > { %v1137_v47 = vpop.f32.mrb[11].mxu1 }
 0x209   : > { %v948_v3 = vadd.f32 %v1135_v38, %v1659_v16  ;;  %v1138_v30 = vadd.f32 %v1137_v47, %v1136_v43 }
 0x20b   : > { %990 = vst [vmem:[%s1664_s27 + $0x20] sm:$0xff] %v948_v3  ;;  %v951_v49 = vadd.f32 %v1138_v30, %v1659_v16 }
 0x20d   : > { %991 = vst [vmem:[%s1664_s27 + $0x28] sm:$0xff] %v951_v49 }
 0x211   : > { %v1139_v51 = vpop.f32.mrb[12].mxu1 }
 0x212   : > { %v1140_v54 = vpop.f32.mrb[13].mxu1 }
 0x213   : > { %v1141_v52 = vadd.f32 %v1140_v54, %v1139_v51  ;;  %v1142_v48 = vpop.f32.mrb[14].mxu1 }
 0x214   : > { %v1143_v50 = vpop.f32.mrb[15].mxu1 }
 0x215   : > { %v956_v55 = vadd.f32 %v1141_v52, %v1659_v16  ;;  %v1144_v57 = vadd.f32 %v1143_v50, %v1142_v48 }
 0x217   : > { %992 = vst [vmem:[%s1664_s27 + $0x30] sm:$0xff] %v956_v55  ;;  %v959_v58 = vadd.f32 %v1144_v57, %v1659_v16 }
 0x219   : > { %993 = vst [vmem:[%s1664_s27 + $0x38] sm:$0xff] %v959_v58 }
 0x21a   : > { %v1145_v60 = vpop.f32.mrb[16].mxu1 }
 0x21b   : > { %v1146_v61 = vpop.f32.mrb[17].mxu1 }
 0x21c   : > { %v1147_v63 = vadd.f32 %v1146_v61, %v1145_v60  ;;  %v1148_v40 = vpop.f32.mrb[18].mxu1 }
 0x21d   : > { %v1149_v2 = vpop.f32.mrb[19].mxu1 }
 0x21e   : > { %v964_v59 = vadd.f32 %v1147_v63, %v1659_v16  ;;  %v1150_v4 = vadd.f32 %v1149_v2, %v1148_v40 }
 0x220   : > { %994 = vst [vmem:[%s1664_s27 + $0x40] sm:$0xff] %v964_v59  ;;  %v967_v39 = vadd.f32 %v1150_v4, %v1659_v16 }
 0x222   : > { %995 = vst [vmem:[%s1664_s27 + $0x48] sm:$0xff] %v967_v39  ;;  %v1151_v5 = vpop.f32.mrb[20].mxu1 }
 0x223   : > { %v1152_v44 = vpop.f32.mrb[21].mxu1 }
 0x224   : > { %v1153_v56 = vadd.f32 %v1152_v44, %v1151_v5  ;;  %v1154_v33 = vpop.f32.mrb[22].mxu1 }
 0x225   : > { %v1155_v25 = vpop.f32.mrb[23].mxu1 }
 0x226   : > { %v972_v9 = vadd.f32 %v1153_v56, %v1659_v16  ;;  %v1156_v41 = vadd.f32 %v1155_v25, %v1154_v33 }
 0x228   : > { %996 = vst [vmem:[%s1664_s27 + $0x50] sm:$0xff] %v972_v9  ;;  %v975_v62 = vadd.f32 %v1156_v41, %v1659_v16 }
 0x22a   : > { %997 = vst [vmem:[%s1664_s27 + $0x58] sm:$0xff] %v975_v62  ;;  %v1157_v10 = vpop.f32.mrb[24].mxu1 }
 0x22b   : > { %v1158_v53 = vpop.f32.mrb[25].mxu1 }
 0x22c   : > { %v1159_v12 = vadd.f32 %v1158_v53, %v1157_v10  ;;  %v1160_v24 = vpop.f32.mrb[26].mxu1 }
 0x22d   : > { %v1161_v6 = vpop.f32.mrb[27].mxu1 }
 0x22e   : > { %v980_v15 = vadd.f32 %v1159_v12, %v1659_v16  ;;  %v1162_v17 = vadd.f32 %v1161_v6, %v1160_v24 }
 0x230   : > { %998 = vst [vmem:[%s1664_s27 + $0x60] sm:$0xff] %v980_v15  ;;  %v983_v28 = vadd.f32 %v1162_v17, %v1659_v16 }
 0x232   : > { %999 = vst [vmem:[%s1664_s27 + $0x68] sm:$0xff] %v983_v28 }
 0x233 PF: > { %s15_s18 = sadd.s32 1, %s1281_s18  }
 0x234   : > { %p12_p4 = scmp.ge.s32.totalorder %s15_s18, 4  }
 0x236   :  { %14 = sbr.rel (!%p12_p4) target bundleno = 1 (0x1), region = 70 }

</bundles_post_ra>
